<compile_context>
chip_gen: v7x
topology: tpu7x:2x2x1
jax: 0.10.0
libtpu: 0.0.40
codegen_flags: <defaults>
</compile_context>

<pallas_src>
import functools

import jax
import jax.numpy as jnp
from jax import lax
from jax.experimental import pallas as pl
from jax.experimental.pallas import tpu as pltpu


_VMEM_SPEC = pl.BlockSpec(memory_space=pltpu.MemorySpace.VMEM)


# ----------------------------------------------------------------------------
# Fused per-layer kernel: input projection + bidirectional recurrence (+ heads)
# ----------------------------------------------------------------------------
def _fused_bilstm_kernel(*refs, S, N, H, with_heads, use_bf16):
    if with_heads:
        (x_ref, w_ih_ref, b_ref, w_hh_ref, w_hf_ref, w_hb_ref, b_head_ref,
         out_ref, hc_ref, gx_ref) = refs
    else:
        (x_ref, w_ih_ref, b_ref, w_hh_ref, out_ref, gx_ref) = refs

    mm = jnp.bfloat16 if use_bf16 else jnp.float32
    E_in = x_ref.shape[-1]
    H4 = 4 * H

    # ---- (1) Hoisted input projection: one MXU matmul covering both directions. ----
    x_flat = x_ref[...].reshape(S * N, E_in)
    gx = jnp.dot(x_flat.astype(mm), w_ih_ref[...].astype(mm),
                 preferred_element_type=jnp.float32) + b_ref[...]        # (S*N, 8H)
    # Stash in the sublane-stacked layout the recurrence consumes:
    #   gx_ref[t, 0:N , :] = fwd gate inputs at time t
    #   gx_ref[t, N:2N, :] = bwd gate inputs at time t
    gx_ref[:, 0:N, :] = gx[:, 0:H4].reshape(S, N, H4)
    gx_ref[:, N:2 * N, :] = gx[:, H4:2 * H4].reshape(S, N, H4)

    w_hh = w_hh_ref[...].astype(mm)                                      # (H, 8H)

    def step(t, tb, h_stack, c_stack):
        """One fused fwd(t)/bwd(tb) timestep on the sublane-stacked state (2N, H)."""
        # Single recurrent MXU op per step for both directions.
        rec = jnp.dot(h_stack.astype(mm), w_hh,
                      preferred_element_type=jnp.float32)                # (2N, 8H)
        gates = jnp.concatenate(
            [gx_ref[t, 0:N, :] + rec[0:N, 0:H4],
             gx_ref[tb, N:2 * N, :] + rec[N:2 * N, H4:2 * H4]], axis=0)  # (2N, 4H)
        # Reordered gate layout (i, f, o, g): one sigmoid slab + one tanh for both dirs.
        sig = jax.nn.sigmoid(gates[:, 0:3 * H])
        i = sig[:, 0:H]
        f = sig[:, H:2 * H]
        o = sig[:, 2 * H:3 * H]
        g = jnp.tanh(gates[:, 3 * H:4 * H])
        c_new = f * c_stack + i * g
        h_new = o * jnp.tanh(c_new)
        return h_new, c_new

    h_stack = jnp.zeros((2 * N, H), jnp.float32)
    c_stack = jnp.zeros((2 * N, H), jnp.float32)

    if S <= 16:
        # Fully unrolled small sequences: buffer all steps and issue two wide stores
        # at the end instead of 2*S small masked per-step stores.
        hs_f = [None] * S
        hs_b = [None] * S
        for t in range(S):
            tb = S - 1 - t
            h_stack, c_stack = step(t, tb, h_stack, c_stack)
            hs_f[t] = h_stack[0:N]
            hs_b[tb] = h_stack[N:2 * N]
        out_ref[:, :, 0:H] = jnp.stack(hs_f, axis=0)
        out_ref[:, :, H:2 * H] = jnp.stack(hs_b, axis=0)
    else:
        # Partial unroll keeps LLO scheduling visibility while bounding vreg live ranges.
        def body(t, carry):
            hs, cs = carry
            tb = S - 1 - t
            hs, cs = step(t, tb, hs, cs)
            out_ref[t, :, 0:H] = hs[0:N]
            out_ref[tb, :, H:2 * H] = hs[N:2 * N]
            return hs, cs

        h_stack, c_stack = lax.fori_loop(0, S, body, (h_stack, c_stack), unroll=4)

    if with_heads:
        # Fused fc_hidden / fc_cell heads on the layer-0 final (h, c) states.
        # Pre-split weights (fwd-half / bwd-half) avoid any lane concat.
        h_f = h_stack[0:N].astype(mm)
        h_b = h_stack[N:2 * N].astype(mm)
        c_f = c_stack[0:N].astype(mm)
        c_b = c_stack[N:2 * N].astype(mm)
        w_hf = w_hf_ref[...].astype(mm)       # (2, H, H)
        w_hb = w_hb_ref[...].astype(mm)
        hc_ref[0] = (jnp.dot(h_f, w_hf[0], preferred_element_type=jnp.float32)
                     + jnp.dot(h_b, w_hb[0], preferred_element_type=jnp.float32)
                     + b_head_ref[0])
        hc_ref[1] = (jnp.dot(c_f, w_hf[1], preferred_element_type=jnp.float32)
                     + jnp.dot(c_b, w_hb[1], preferred_element_type=jnp.float32)
                     + b_head_ref[1])


def _fused_bilstm_layer(x_seq, layer_p, heads, *, use_bf16):
    """x_seq: (S, N, E_in) f32 -> (out (S, N, 2H), hc (2, N, H) or None)."""
    S, N, _ = x_seq.shape
    H = layer_p["w_hh"].shape[0]
    with_heads = heads is not None

    kernel = functools.partial(_fused_bilstm_kernel, S=S, N=N, H=H,
                               with_heads=with_heads, use_bf16=use_bf16)

    args = [x_seq, layer_p["w_ih_t"], layer_p["b"], layer_p["w_hh"]]
    out_shapes = [jax.ShapeDtypeStruct((S, N, 2 * H), jnp.float32)]
    if with_heads:
        args += [heads["w_f"], heads["w_b"], heads["b"]]
        out_shapes.append(jax.ShapeDtypeStruct((2, N, H), jnp.float32))

    # TODO(synk): once a time-grid streaming design is added for production sizes,
    # set pltpu.CompilerParams(dimension_semantics=..., vmem_limit_bytes=...) per
    # generation (16 MiB scoped v5e, 32 MiB v6e/v7x, 64 MiB physical v7x).
    result = pl.pallas_call(
        kernel,
        out_shape=tuple(out_shapes) if with_heads else out_shapes[0],
        in_specs=[_VMEM_SPEC] * len(args),
        out_specs=(_VMEM_SPEC, _VMEM_SPEC) if with_heads else _VMEM_SPEC,
        scratch_shapes=[pltpu.VMEM((S, 2 * N, 4 * H), jnp.float32)],
    )(*args)

    if with_heads:
        return result[0], result[1]
    return result, None


# ----------------------------------------------------------------------------
# Encoder_att forward
# ----------------------------------------------------------------------------
@functools.partial(jax.jit, static_argnames=("use_bf16",))
def encoder_att_forward(packed, x_tokens, use_bf16=False):
    """x_tokens: (S, N) int32.  Returns (encoder_states, hidden, cell)."""
    S, N = x_tokens.shape

    # Pad batch to full sublanes (multiple of 8); padded columns are independent.
    N_pad = ((N + 7) // 8) * 8
    x_pad = jnp.pad(x_tokens, ((0, 0), (0, N_pad - N))) if N_pad != N else x_tokens

    # TODO(synk): fuse this gather into the layer-0 kernel via scalar-prefetch DMA
    # gather for large vocabularies; at demo vocab it is a tiny XLA gather.
    emb = jnp.take(packed["embedding"], x_pad, axis=0)        # (S, N_pad, E)
    # dropout: eval-mode identity

    layer_in = emb
    hc = None
    for li, lp in enumerate(packed["layers"]):
        # PyTorch's hidden[0:1]/hidden[1:2] are the LAYER-0 fwd/bwd final states,
        # so the heads are fused only into the layer-0 kernel.
        heads = packed["heads"] if li == 0 else None
        layer_in, maybe_hc = _fused_bilstm_layer(layer_in, lp, heads, use_bf16=use_bf16)
        if li == 0:
            hc = maybe_hc

    encoder_states = layer_in[:, :N, :]                       # (S, N, 2H)
    hidden = hc[0:1, :N, :]                                   # (1, N, H)
    cell = hc[1:2, :N, :]                                     # (1, N, H)
    return encoder_states, hidden, cell


# ----------------------------------------------------------------------------
# Parameter construction (PyTorch-style) and one-time packing into TPU layouts
# ----------------------------------------------------------------------------
def make_params(key, input_size, embedding_size, hidden_size, num_layers):
    keys = iter(jax.random.split(key, 4 + 8 * num_layers + 4))
    k_lstm = 1.0 / jnp.sqrt(hidden_size)
    k_fc = 1.0 / jnp.sqrt(2 * hidden_size)

    def u(k, shape, scale):
        return jax.random.uniform(k, shape, jnp.float32, -scale, scale)

    params = {"embedding": jax.random.normal(next(keys),
                                             (input_size, embedding_size),
                                             jnp.float32)}
    lstm = []
    in_dim = embedding_size
    for _ in range(num_layers):
        lp = {
            "w_ih_f": u(next(keys), (4 * hidden_size, in_dim), k_lstm),
            "w_hh_f": u(next(keys), (4 * hidden_size, hidden_size), k_lstm),
            "b_ih_f": u(next(keys), (4 * hidden_size,), k_lstm),
            "b_hh_f": u(next(keys), (4 * hidden_size,), k_lstm),
            "w_ih_b": u(next(keys), (4 * hidden_size, in_dim), k_lstm),
            "w_hh_b": u(next(keys), (4 * hidden_size, hidden_size), k_lstm),
            "b_ih_b": u(next(keys), (4 * hidden_size,), k_lstm),
            "b_hh_b": u(next(keys), (4 * hidden_size,), k_lstm),
        }
        lstm.append(lp)
        in_dim = 2 * hidden_size
    params["lstm"] = lstm
    params["fc_hidden_w"] = u(next(keys), (hidden_size, 2 * hidden_size), k_fc)
    params["fc_hidden_b"] = u(next(keys), (hidden_size,), k_fc)
    params["fc_cell_w"] = u(next(keys), (hidden_size, 2 * hidden_size), k_fc)
    params["fc_cell_b"] = u(next(keys), (hidden_size,), k_fc)
    return params


def _reorder_gate_rows(w):
    """PyTorch packs gate blocks (i, f, g, o) along axis 0; reorder to (i, f, o, g)."""
    H = w.shape[0] // 4
    return jnp.concatenate([w[0:2 * H], w[3 * H:4 * H], w[2 * H:3 * H]], axis=0)


def pack_params(params):
    """One-time re-layout of PyTorch-style weights into the kernel's fused layouts."""
    H = params["lstm"][0]["w_hh_f"].shape[1]
    layers = []
    for lp in params["lstm"]:
        w_f = _reorder_gate_rows(lp["w_ih_f"])                 # (4H, E_in)
        w_b = _reorder_gate_rows(lp["w_ih_b"])
        b_f = _reorder_gate_rows(lp["b_ih_f"] + lp["b_hh_f"])
        b_b = _reorder_gate_rows(lp["b_ih_b"] + lp["b_hh_b"])
        layers.append({
            # Hoisted input-projection weight for both directions: (E_in, 8H).
            "w_ih_t": jnp.concatenate([w_f, w_b], axis=0).T,
            "b": jnp.concatenate([b_f, b_b], axis=0).reshape(1, 8 * H),
            # Fused recurrent weight, shared-K form: cols [0:4H]=fwd, [4H:8H]=bwd.
            "w_hh": jnp.concatenate([_reorder_gate_rows(lp["w_hh_f"]).T,
                                     _reorder_gate_rows(lp["w_hh_b"]).T], axis=1),
        })
    heads = {
        "w_f": jnp.stack([params["fc_hidden_w"][:, :H].T,
                          params["fc_cell_w"][:, :H].T], axis=0),   # (2, H, H)
        "w_b": jnp.stack([params["fc_hidden_w"][:, H:].T,
                          params["fc_cell_w"][:, H:].T], axis=0),   # (2, H, H)
        "b": jnp.stack([params["fc_hidden_b"],
                        params["fc_cell_b"]], axis=0).reshape(2, 1, H),
    }
    return {"embedding": params["embedding"], "layers": layers, "heads": heads}


# ----------------------------------------------------------------------------
# Pure-JAX reference (for correctness check)
# ----------------------------------------------------------------------------
def _ref_lstm_dir(x_emb, w_ih, w_hh, b_ih, b_hh, reverse):
    S, N, _ = x_emb.shape
    H = w_hh.shape[1]
    h = jnp.zeros((N, H), jnp.float32)
    c = jnp.zeros((N, H), jnp.float32)
    outs = [None] * S
    order = range(S - 1, -1, -1) if reverse else range(S)
    for t in order:
        g = x_emb[t] @ w_ih.T + h @ w_hh.T + b_ih + b_hh
        i = jax.nn.sigmoid(g[:, 0 * H:1 * H])
        f = jax.nn.sigmoid(g[:, 1 * H:2 * H])
        gg = jnp.tanh(g[:, 2 * H:3 * H])
        o = jax.nn.sigmoid(g[:, 3 * H:4 * H])
        c = f * c + i * gg
        h = o * jnp.tanh(c)
        outs[t] = h
    return jnp.stack(outs, axis=0), h, c


def encoder_att_reference(params, x_tokens):
    emb = jnp.take(params["embedding"], x_tokens, axis=0)
    layer_in = emb
    h0f = h0b = c0f = c0b = None
    for li, lp in enumerate(params["lstm"]):
        of, hf, cf = _ref_lstm_dir(layer_in, lp["w_ih_f"], lp["w_hh_f"],
                                   lp["b_ih_f"], lp["b_hh_f"], False)
        ob, hb, cb = _ref_lstm_dir(layer_in, lp["w_ih_b"], lp["w_hh_b"],
                                   lp["b_ih_b"], lp["b_hh_b"], True)
        layer_in = jnp.concatenate([of, ob], axis=2)
        if li == 0:
            h0f, h0b, c0f, c0b = hf, hb, cf, cb
    N = x_tokens.shape[1]
    H = params["lstm"][0]["w_hh_f"].shape[1]
    hidden = (jnp.concatenate([h0f, h0b], axis=1) @ params["fc_hidden_w"].T
              + params["fc_hidden_b"]).reshape(1, N, H)
    cell = (jnp.concatenate([c0f, c0b], axis=1) @ params["fc_cell_w"].T
            + params["fc_cell_b"]).reshape(1, N, H)
    return layer_in, hidden, cell


if __name__ == "__main__":
    INPUT_SIZE = 50        # vocab
    EMBEDDING_SIZE = 32
    HIDDEN_SIZE = 32
    SEQ_LEN = 8
    BATCH = 2

    root = jax.random.PRNGKey(0)
    k_p1, k_p2, k_tok = jax.random.split(root, 3)
    x = jax.random.randint(k_tok, (SEQ_LEN, BATCH), 0, INPUT_SIZE, dtype=jnp.int32)

    # --- 1 bidirectional layer, f32 MXU operands (tight correctness) ---
    params1 = make_params(k_p1, INPUT_SIZE, EMBEDDING_SIZE, HIDDEN_SIZE, 1)
    packed1 = pack_params(params1)
    enc, hid, cel = encoder_att_forward(packed1, x)
    jax.block_until_ready((enc, hid, cel))

    r_enc, r_hid, r_cel = encoder_att_reference(params1, x)
    assert enc.shape == (SEQ_LEN, BATCH, 2 * HIDDEN_SIZE)
    assert hid.shape == (1, BATCH, HIDDEN_SIZE)
    assert cel.shape == (1, BATCH, HIDDEN_SIZE)
    assert jnp.allclose(enc, r_enc, atol=1e-4, rtol=1e-4)
    assert jnp.allclose(hid, r_hid, atol=1e-4, rtol=1e-4)
    assert jnp.allclose(cel, r_cel, atol=1e-4, rtol=1e-4)

    # --- 2 stacked bidirectional layers (exercises the no-heads layer kernel) ---
    params2 = make_params(k_p2, INPUT_SIZE, EMBEDDING_SIZE, HIDDEN_SIZE, 2)
    packed2 = pack_params(params2)
    enc2, hid2, cel2 = encoder_att_forward(packed2, x)
    jax.block_until_ready((enc2, hid2, cel2))
    r_enc2, r_hid2, r_cel2 = encoder_att_reference(params2, x)
    assert jnp.allclose(enc2, r_enc2, atol=1e-4, rtol=1e-4)
    assert jnp.allclose(hid2, r_hid2, atol=1e-4, rtol=1e-4)
    assert jnp.allclose(cel2, r_cel2, atol=1e-4, rtol=1e-4)

    # --- bf16 MXU operands (f32 accumulation + f32 gate math): loose re-validation ---
    enc_b, hid_b, cel_b = encoder_att_forward(packed1, x, use_bf16=True)
    jax.block_until_ready((enc_b, hid_b, cel_b))
    assert jnp.allclose(enc_b, r_enc, atol=1e-1, rtol=1e-1)
    assert jnp.allclose(hid_b, r_hid, atol=1e-1, rtol=1e-1)
    assert jnp.allclose(cel_b, r_cel, atol=1e-1, rtol=1e-1)

    print("KERNEL_OK")
</pallas_src>

<mosaic_0001>
module attributes {stable_mosaic.version = 11 : i64} {
  func.func @_fused_bilstm_kernel(%arg0: memref<8x8x32xf32, #tpu.memory_space<vmem>>, %arg1: memref<32x256xf32, #tpu.memory_space<vmem>>, %arg2: memref<1x256xf32, #tpu.memory_space<vmem>>, %arg3: memref<32x256xf32, #tpu.memory_space<vmem>>, %arg4: memref<2x32x32xf32, #tpu.memory_space<vmem>>, %arg5: memref<2x32x32xf32, #tpu.memory_space<vmem>>, %arg6: memref<2x1x32xf32, #tpu.memory_space<vmem>>, %arg7: memref<8x8x64xf32, #tpu.memory_space<vmem>>, %arg8: memref<2x8x32xf32, #tpu.memory_space<vmem>>, %arg9: memref<8x16x128xf32, #tpu.memory_space<vmem>>) attributes {dimension_semantics = [], scalar_prefetch = 0 : i64, scratch_operands = 1 : i64, tpu.core_type = #tpu.core_type<tc>} {
    %c0 = arith.constant 0 : index
    %c0_0 = arith.constant 0 : index
    %c0_1 = arith.constant 0 : index
    %0 = vector.load %arg0[%c0, %c0_0, %c0_1] : memref<8x8x32xf32, #tpu.memory_space<vmem>>, vector<8x8x32xf32>
    %1 = vector.shape_cast %0 : vector<8x8x32xf32> to vector<64x32xf32>
    %c0_2 = arith.constant 0 : index
    %c0_3 = arith.constant 0 : index
    %2 = vector.load %arg1[%c0_2, %c0_3] : memref<32x256xf32, #tpu.memory_space<vmem>>, vector<32x256xf32>
    %cst = arith.constant dense<0.000000e+00> : vector<64x256xf32>
    %3 = tpu.matmul %1, %2, %cst {dimension_numbers = #tpu.dot_dimension_numbers<[1], [0], [0], [1], [0, 0, 1, 1], [], []>} : vector<64x32xf32>, vector<32x256xf32>, vector<64x256xf32> -> vector<64x256xf32>
    %c0_4 = arith.constant 0 : index
    %c0_5 = arith.constant 0 : index
    %4 = vector.load %arg2[%c0_4, %c0_5] : memref<1x256xf32, #tpu.memory_space<vmem>>, vector<1x256xf32>
    %5 = vector.broadcast %4 : vector<1x256xf32> to vector<64x256xf32>
    %6 = arith.addf %3, %5 : vector<64x256xf32>
    %7 = vector.extract_strided_slice %6 {offsets = [0, 0], sizes = [64, 128], strides = [1, 1]} : vector<64x256xf32> to vector<64x128xf32>
    %8 = vector.shape_cast %7 : vector<64x128xf32> to vector<8x8x128xf32>
    %c0_6 = arith.constant 0 : index
    %c0_7 = arith.constant 0 : index
    %c0_8 = arith.constant 0 : index
    %9 = vector.load %arg9[%c0_6, %c0_7, %c0_8] : memref<8x16x128xf32, #tpu.memory_space<vmem>>, vector<8x8x128xf32>
    tpu.vector_store %arg9[%c0_6, %c0_7, %c0_8], %8 {strides = array<i32>} : memref<8x16x128xf32, #tpu.memory_space<vmem>>, vector<8x8x128xf32>,
    %10 = vector.extract_strided_slice %6 {offsets = [0, 128], sizes = [64, 128], strides = [1, 1]} : vector<64x256xf32> to vector<64x128xf32>
    %11 = vector.shape_cast %10 : vector<64x128xf32> to vector<8x8x128xf32>
    %c0_9 = arith.constant 0 : index
    %c8 = arith.constant 8 : index
    %c0_10 = arith.constant 0 : index
    %12 = vector.load %arg9[%c0_9, %c8, %c0_10] : memref<8x16x128xf32, #tpu.memory_space<vmem>>, vector<8x8x128xf32>
    tpu.vector_store %arg9[%c0_9, %c8, %c0_10], %11 {strides = array<i32>} : memref<8x16x128xf32, #tpu.memory_space<vmem>>, vector<8x8x128xf32>,
    %c0_11 = arith.constant 0 : index
    %c0_12 = arith.constant 0 : index
    %13 = vector.load %arg3[%c0_11, %c0_12] : memref<32x256xf32, #tpu.memory_space<vmem>>, vector<32x256xf32>
    %cst_13 = arith.constant 0.000000e+00 : f32
    %14 = vector.broadcast %cst_13 : f32 to vector<16x32xf32>
    %cst_14 = arith.constant 0.000000e+00 : f32
    %15 = vector.broadcast %cst_14 : f32 to vector<16x32xf32>
    %cst_15 = arith.constant dense<0.000000e+00> : vector<16x256xf32>
    %16 = tpu.matmul %14, %13, %cst_15 {dimension_numbers = #tpu.dot_dimension_numbers<[1], [0], [0], [1], [0, 0, 1, 1], [], []>} : vector<16x32xf32>, vector<32x256xf32>, vector<16x256xf32> -> vector<16x256xf32>
    %c0_16 = arith.constant 0 : index
    %c0_17 = arith.constant 0 : index
    %c0_18 = arith.constant 0 : index
    %17 = vector.load %arg9[%c0_16, %c0_17, %c0_18] : memref<8x16x128xf32, #tpu.memory_space<vmem>>, vector<1x8x128xf32>
    %18 = vector.shape_cast %17 : vector<1x8x128xf32> to vector<8x128xf32>
    %19 = vector.extract_strided_slice %16 {offsets = [0, 0], sizes = [8, 128], strides = [1, 1]} : vector<16x256xf32> to vector<8x128xf32>
    %20 = arith.addf %18, %19 : vector<8x128xf32>
    %c7 = arith.constant 7 : index
    %c8_19 = arith.constant 8 : index
    %c0_20 = arith.constant 0 : index
    %21 = vector.load %arg9[%c7, %c8_19, %c0_20] : memref<8x16x128xf32, #tpu.memory_space<vmem>>, vector<1x8x128xf32>
    %22 = vector.shape_cast %21 : vector<1x8x128xf32> to vector<8x128xf32>
    %23 = vector.extract_strided_slice %16 {offsets = [8, 128], sizes = [8, 128], strides = [1, 1]} : vector<16x256xf32> to vector<8x128xf32>
    %24 = arith.addf %22, %23 : vector<8x128xf32>
    %25 = tpu.concatenate %20, %24 in 0 : vector<8x128xf32>, vector<8x128xf32> -> vector<16x128xf32>
    %26 = vector.extract_strided_slice %25 {offsets = [0, 0], sizes = [16, 96], strides = [1, 1]} : vector<16x128xf32> to vector<16x96xf32>
    %27 = arith.negf %26 : vector<16x96xf32>
    %28 = math.exp %27 : vector<16x96xf32>
    %cst_21 = arith.constant 1.000000e+00 : f32
    %29 = vector.broadcast %cst_21 : f32 to vector<16x96xf32>
    %30 = arith.addf %29, %28 : vector<16x96xf32>
    %31 = arith.divf %29, %30 : vector<16x96xf32>
    %32 = vector.extract_strided_slice %31 {offsets = [0, 0], sizes = [16, 32], strides = [1, 1]} : vector<16x96xf32> to vector<16x32xf32>
    %33 = vector.extract_strided_slice %31 {offsets = [0, 32], sizes = [16, 32], strides = [1, 1]} : vector<16x96xf32> to vector<16x32xf32>
    %34 = vector.extract_strided_slice %31 {offsets = [0, 64], sizes = [16, 32], strides = [1, 1]} : vector<16x96xf32> to vector<16x32xf32>
    %35 = vector.extract_strided_slice %25 {offsets = [0, 96], sizes = [16, 32], strides = [1, 1]} : vector<16x128xf32> to vector<16x32xf32>
    %36 = math.tanh %35 : vector<16x32xf32>
    %37 = arith.mulf %33, %15 : vector<16x32xf32>
    %38 = arith.mulf %32, %36 : vector<16x32xf32>
    %39 = arith.addf %37, %38 : vector<16x32xf32>
    %40 = math.tanh %39 : vector<16x32xf32>
    %41 = arith.mulf %34, %40 : vector<16x32xf32>
    %42 = vector.extract_strided_slice %41 {offsets = [0, 0], sizes = [8, 32], strides = [1, 1]} : vector<16x32xf32> to vector<8x32xf32>
    %43 = vector.extract_strided_slice %41 {offsets = [8, 0], sizes = [8, 32], strides = [1, 1]} : vector<16x32xf32> to vector<8x32xf32>
    %cst_22 = arith.constant dense<0.000000e+00> : vector<16x256xf32>
    %44 = tpu.matmul %41, %13, %cst_22 {dimension_numbers = #tpu.dot_dimension_numbers<[1], [0], [0], [1], [0, 0, 1, 1], [], []>} : vector<16x32xf32>, vector<32x256xf32>, vector<16x256xf32> -> vector<16x256xf32>
    %c1 = arith.constant 1 : index
    %c0_23 = arith.constant 0 : index
    %c0_24 = arith.constant 0 : index
    %45 = vector.load %arg9[%c1, %c0_23, %c0_24] : memref<8x16x128xf32, #tpu.memory_space<vmem>>, vector<1x8x128xf32>
    %46 = vector.shape_cast %45 : vector<1x8x128xf32> to vector<8x128xf32>
    %47 = vector.extract_strided_slice %44 {offsets = [0, 0], sizes = [8, 128], strides = [1, 1]} : vector<16x256xf32> to vector<8x128xf32>
    %48 = arith.addf %46, %47 : vector<8x128xf32>
    %c6 = arith.constant 6 : index
    %c8_25 = arith.constant 8 : index
    %c0_26 = arith.constant 0 : index
    %49 = vector.load %arg9[%c6, %c8_25, %c0_26] : memref<8x16x128xf32, #tpu.memory_space<vmem>>, vector<1x8x128xf32>
    %50 = vector.shape_cast %49 : vector<1x8x128xf32> to vector<8x128xf32>
    %51 = vector.extract_strided_slice %44 {offsets = [8, 128], sizes = [8, 128], strides = [1, 1]} : vector<16x256xf32> to vector<8x128xf32>
    %52 = arith.addf %50, %51 : vector<8x128xf32>
    %53 = tpu.concatenate %48, %52 in 0 : vector<8x128xf32>, vector<8x128xf32> -> vector<16x128xf32>
    %54 = vector.extract_strided_slice %53 {offsets = [0, 0], sizes = [16, 96], strides = [1, 1]} : vector<16x128xf32> to vector<16x96xf32>
    %55 = arith.negf %54 : vector<16x96xf32>
    %56 = math.exp %55 : vector<16x96xf32>
    %cst_27 = arith.constant 1.000000e+00 : f32
    %57 = vector.broadcast %cst_27 : f32 to vector<16x96xf32>
    %58 = arith.addf %57, %56 : vector<16x96xf32>
    %59 = arith.divf %57, %58 : vector<16x96xf32>
    %60 = vector.extract_strided_slice %59 {offsets = [0, 0], sizes = [16, 32], strides = [1, 1]} : vector<16x96xf32> to vector<16x32xf32>
    %61 = vector.extract_strided_slice %59 {offsets = [0, 32], sizes = [16, 32], strides = [1, 1]} : vector<16x96xf32> to vector<16x32xf32>
    %62 = vector.extract_strided_slice %59 {offsets = [0, 64], sizes = [16, 32], strides = [1, 1]} : vector<16x96xf32> to vector<16x32xf32>
    %63 = vector.extract_strided_slice %53 {offsets = [0, 96], sizes = [16, 32], strides = [1, 1]} : vector<16x128xf32> to vector<16x32xf32>
    %64 = math.tanh %63 : vector<16x32xf32>
    %65 = arith.mulf %61, %39 : vector<16x32xf32>
    %66 = arith.mulf %60, %64 : vector<16x32xf32>
    %67 = arith.addf %65, %66 : vector<16x32xf32>
    %68 = math.tanh %67 : vector<16x32xf32>
    %69 = arith.mulf %62, %68 : vector<16x32xf32>
    %70 = vector.extract_strided_slice %69 {offsets = [0, 0], sizes = [8, 32], strides = [1, 1]} : vector<16x32xf32> to vector<8x32xf32>
    %71 = vector.extract_strided_slice %69 {offsets = [8, 0], sizes = [8, 32], strides = [1, 1]} : vector<16x32xf32> to vector<8x32xf32>
    %cst_28 = arith.constant dense<0.000000e+00> : vector<16x256xf32>
    %72 = tpu.matmul %69, %13, %cst_28 {dimension_numbers = #tpu.dot_dimension_numbers<[1], [0], [0], [1], [0, 0, 1, 1], [], []>} : vector<16x32xf32>, vector<32x256xf32>, vector<16x256xf32> -> vector<16x256xf32>
    %c2 = arith.constant 2 : index
    %c0_29 = arith.constant 0 : index
    %c0_30 = arith.constant 0 : index
    %73 = vector.load %arg9[%c2, %c0_29, %c0_30] : memref<8x16x128xf32, #tpu.memory_space<vmem>>, vector<1x8x128xf32>
    %74 = vector.shape_cast %73 : vector<1x8x128xf32> to vector<8x128xf32>
    %75 = vector.extract_strided_slice %72 {offsets = [0, 0], sizes = [8, 128], strides = [1, 1]} : vector<16x256xf32> to vector<8x128xf32>
    %76 = arith.addf %74, %75 : vector<8x128xf32>
    %c5 = arith.constant 5 : index
    %c8_31 = arith.constant 8 : index
    %c0_32 = arith.constant 0 : index
    %77 = vector.load %arg9[%c5, %c8_31, %c0_32] : memref<8x16x128xf32, #tpu.memory_space<vmem>>, vector<1x8x128xf32>
    %78 = vector.shape_cast %77 : vector<1x8x128xf32> to vector<8x128xf32>
    %79 = vector.extract_strided_slice %72 {offsets = [8, 128], sizes = [8, 128], strides = [1, 1]} : vector<16x256xf32> to vector<8x128xf32>
    %80 = arith.addf %78, %79 : vector<8x128xf32>
    %81 = tpu.concatenate %76, %80 in 0 : vector<8x128xf32>, vector<8x128xf32> -> vector<16x128xf32>
    %82 = vector.extract_strided_slice %81 {offsets = [0, 0], sizes = [16, 96], strides = [1, 1]} : vector<16x128xf32> to vector<16x96xf32>
    %83 = arith.negf %82 : vector<16x96xf32>
    %84 = math.exp %83 : vector<16x96xf32>
    %cst_33 = arith.constant 1.000000e+00 : f32
    %85 = vector.broadcast %cst_33 : f32 to vector<16x96xf32>
    %86 = arith.addf %85, %84 : vector<16x96xf32>
    %87 = arith.divf %85, %86 : vector<16x96xf32>
    %88 = vector.extract_strided_slice %87 {offsets = [0, 0], sizes = [16, 32], strides = [1, 1]} : vector<16x96xf32> to vector<16x32xf32>
    %89 = vector.extract_strided_slice %87 {offsets = [0, 32], sizes = [16, 32], strides = [1, 1]} : vector<16x96xf32> to vector<16x32xf32>
    %90 = vector.extract_strided_slice %87 {offsets = [0, 64], sizes = [16, 32], strides = [1, 1]} : vector<16x96xf32> to vector<16x32xf32>
    %91 = vector.extract_strided_slice %81 {offsets = [0, 96], sizes = [16, 32], strides = [1, 1]} : vector<16x128xf32> to vector<16x32xf32>
    %92 = math.tanh %91 : vector<16x32xf32>
    %93 = arith.mulf %89, %67 : vector<16x32xf32>
    %94 = arith.mulf %88, %92 : vector<16x32xf32>
    %95 = arith.addf %93, %94 : vector<16x32xf32>
    %96 = math.tanh %95 : vector<16x32xf32>
    %97 = arith.mulf %90, %96 : vector<16x32xf32>
    %98 = vector.extract_strided_slice %97 {offsets = [0, 0], sizes = [8, 32], strides = [1, 1]} : vector<16x32xf32> to vector<8x32xf32>
    %99 = vector.extract_strided_slice %97 {offsets = [8, 0], sizes = [8, 32], strides = [1, 1]} : vector<16x32xf32> to vector<8x32xf32>
    %cst_34 = arith.constant dense<0.000000e+00> : vector<16x256xf32>
    %100 = tpu.matmul %97, %13, %cst_34 {dimension_numbers = #tpu.dot_dimension_numbers<[1], [0], [0], [1], [0, 0, 1, 1], [], []>} : vector<16x32xf32>, vector<32x256xf32>, vector<16x256xf32> -> vector<16x256xf32>
    %c3 = arith.constant 3 : index
    %c0_35 = arith.constant 0 : index
    %c0_36 = arith.constant 0 : index
    %101 = vector.load %arg9[%c3, %c0_35, %c0_36] : memref<8x16x128xf32, #tpu.memory_space<vmem>>, vector<1x8x128xf32>
    %102 = vector.shape_cast %101 : vector<1x8x128xf32> to vector<8x128xf32>
    %103 = vector.extract_strided_slice %100 {offsets = [0, 0], sizes = [8, 128], strides = [1, 1]} : vector<16x256xf32> to vector<8x128xf32>
    %104 = arith.addf %102, %103 : vector<8x128xf32>
    %c4 = arith.constant 4 : index
    %c8_37 = arith.constant 8 : index
    %c0_38 = arith.constant 0 : index
    %105 = vector.load %arg9[%c4, %c8_37, %c0_38] : memref<8x16x128xf32, #tpu.memory_space<vmem>>, vector<1x8x128xf32>
    %106 = vector.shape_cast %105 : vector<1x8x128xf32> to vector<8x128xf32>
    %107 = vector.extract_strided_slice %100 {offsets = [8, 128], sizes = [8, 128], strides = [1, 1]} : vector<16x256xf32> to vector<8x128xf32>
    %108 = arith.addf %106, %107 : vector<8x128xf32>
    %109 = tpu.concatenate %104, %108 in 0 : vector<8x128xf32>, vector<8x128xf32> -> vector<16x128xf32>
    %110 = vector.extract_strided_slice %109 {offsets = [0, 0], sizes = [16, 96], strides = [1, 1]} : vector<16x128xf32> to vector<16x96xf32>
    %111 = arith.negf %110 : vector<16x96xf32>
    %112 = math.exp %111 : vector<16x96xf32>
    %cst_39 = arith.constant 1.000000e+00 : f32
    %113 = vector.broadcast %cst_39 : f32 to vector<16x96xf32>
    %114 = arith.addf %113, %112 : vector<16x96xf32>
    %115 = arith.divf %113, %114 : vector<16x96xf32>
    %116 = vector.extract_strided_slice %115 {offsets = [0, 0], sizes = [16, 32], strides = [1, 1]} : vector<16x96xf32> to vector<16x32xf32>
    %117 = vector.extract_strided_slice %115 {offsets = [0, 32], sizes = [16, 32], strides = [1, 1]} : vector<16x96xf32> to vector<16x32xf32>
    %118 = vector.extract_strided_slice %115 {offsets = [0, 64], sizes = [16, 32], strides = [1, 1]} : vector<16x96xf32> to vector<16x32xf32>
    %119 = vector.extract_strided_slice %109 {offsets = [0, 96], sizes = [16, 32], strides = [1, 1]} : vector<16x128xf32> to vector<16x32xf32>
    %120 = math.tanh %119 : vector<16x32xf32>
    %121 = arith.mulf %117, %95 : vector<16x32xf32>
    %122 = arith.mulf %116, %120 : vector<16x32xf32>
    %123 = arith.addf %121, %122 : vector<16x32xf32>
    %124 = math.tanh %123 : vector<16x32xf32>
    %125 = arith.mulf %118, %124 : vector<16x32xf32>
    %126 = vector.extract_strided_slice %125 {offsets = [0, 0], sizes = [8, 32], strides = [1, 1]} : vector<16x32xf32> to vector<8x32xf32>
    %127 = vector.extract_strided_slice %125 {offsets = [8, 0], sizes = [8, 32], strides = [1, 1]} : vector<16x32xf32> to vector<8x32xf32>
    %cst_40 = arith.constant dense<0.000000e+00> : vector<16x256xf32>
    %128 = tpu.matmul %125, %13, %cst_40 {dimension_numbers = #tpu.dot_dimension_numbers<[1], [0], [0], [1], [0, 0, 1, 1], [], []>} : vector<16x32xf32>, vector<32x256xf32>, vector<16x256xf32> -> vector<16x256xf32>
    %c4_41 = arith.constant 4 : index
    %c0_42 = arith.constant 0 : index
    %c0_43 = arith.constant 0 : index
    %129 = vector.load %arg9[%c4_41, %c0_42, %c0_43] : memref<8x16x128xf32, #tpu.memory_space<vmem>>, vector<1x8x128xf32>
    %130 = vector.shape_cast %129 : vector<1x8x128xf32> to vector<8x128xf32>
    %131 = vector.extract_strided_slice %128 {offsets = [0, 0], sizes = [8, 128], strides = [1, 1]} : vector<16x256xf32> to vector<8x128xf32>
    %132 = arith.addf %130, %131 : vector<8x128xf32>
    %c3_44 = arith.constant 3 : index
    %c8_45 = arith.constant 8 : index
    %c0_46 = arith.constant 0 : index
    %133 = vector.load %arg9[%c3_44, %c8_45, %c0_46] : memref<8x16x128xf32, #tpu.memory_space<vmem>>, vector<1x8x128xf32>
    %134 = vector.shape_cast %133 : vector<1x8x128xf32> to vector<8x128xf32>
    %135 = vector.extract_strided_slice %128 {offsets = [8, 128], sizes = [8, 128], strides = [1, 1]} : vector<16x256xf32> to vector<8x128xf32>
    %136 = arith.addf %134, %135 : vector<8x128xf32>
    %137 = tpu.concatenate %132, %136 in 0 : vector<8x128xf32>, vector<8x128xf32> -> vector<16x128xf32>
    %138 = vector.extract_strided_slice %137 {offsets = [0, 0], sizes = [16, 96], strides = [1, 1]} : vector<16x128xf32> to vector<16x96xf32>
    %139 = arith.negf %138 : vector<16x96xf32>
    %140 = math.exp %139 : vector<16x96xf32>
    %cst_47 = arith.constant 1.000000e+00 : f32
    %141 = vector.broadcast %cst_47 : f32 to vector<16x96xf32>
    %142 = arith.addf %141, %140 : vector<16x96xf32>
    %143 = arith.divf %141, %142 : vector<16x96xf32>
    %144 = vector.extract_strided_slice %143 {offsets = [0, 0], sizes = [16, 32], strides = [1, 1]} : vector<16x96xf32> to vector<16x32xf32>
    %145 = vector.extract_strided_slice %143 {offsets = [0, 32], sizes = [16, 32], strides = [1, 1]} : vector<16x96xf32> to vector<16x32xf32>
    %146 = vector.extract_strided_slice %143 {offsets = [0, 64], sizes = [16, 32], strides = [1, 1]} : vector<16x96xf32> to vector<16x32xf32>
    %147 = vector.extract_strided_slice %137 {offsets = [0, 96], sizes = [16, 32], strides = [1, 1]} : vector<16x128xf32> to vector<16x32xf32>
    %148 = math.tanh %147 : vector<16x32xf32>
    %149 = arith.mulf %145, %123 : vector<16x32xf32>
    %150 = arith.mulf %144, %148 : vector<16x32xf32>
    %151 = arith.addf %149, %150 : vector<16x32xf32>
    %152 = math.tanh %151 : vector<16x32xf32>
    %153 = arith.mulf %146, %152 : vector<16x32xf32>
    %154 = vector.extract_strided_slice %153 {offsets = [0, 0], sizes = [8, 32], strides = [1, 1]} : vector<16x32xf32> to vector<8x32xf32>
    %155 = vector.extract_strided_slice %153 {offsets = [8, 0], sizes = [8, 32], strides = [1, 1]} : vector<16x32xf32> to vector<8x32xf32>
    %cst_48 = arith.constant dense<0.000000e+00> : vector<16x256xf32>
    %156 = tpu.matmul %153, %13, %cst_48 {dimension_numbers = #tpu.dot_dimension_numbers<[1], [0], [0], [1], [0, 0, 1, 1], [], []>} : vector<16x32xf32>, vector<32x256xf32>, vector<16x256xf32> -> vector<16x256xf32>
    %c5_49 = arith.constant 5 : index
    %c0_50 = arith.constant 0 : index
    %c0_51 = arith.constant 0 : index
    %157 = vector.load %arg9[%c5_49, %c0_50, %c0_51] : memref<8x16x128xf32, #tpu.memory_space<vmem>>, vector<1x8x128xf32>
    %158 = vector.shape_cast %157 : vector<1x8x128xf32> to vector<8x128xf32>
    %159 = vector.extract_strided_slice %156 {offsets = [0, 0], sizes = [8, 128], strides = [1, 1]} : vector<16x256xf32> to vector<8x128xf32>
    %160 = arith.addf %158, %159 : vector<8x128xf32>
    %c2_52 = arith.constant 2 : index
    %c8_53 = arith.constant 8 : index
    %c0_54 = arith.constant 0 : index
    %161 = vector.load %arg9[%c2_52, %c8_53, %c0_54] : memref<8x16x128xf32, #tpu.memory_space<vmem>>, vector<1x8x128xf32>
    %162 = vector.shape_cast %161 : vector<1x8x128xf32> to vector<8x128xf32>
    %163 = vector.extract_strided_slice %156 {offsets = [8, 128], sizes = [8, 128], strides = [1, 1]} : vector<16x256xf32> to vector<8x128xf32>
    %164 = arith.addf %162, %163 : vector<8x128xf32>
    %165 = tpu.concatenate %160, %164 in 0 : vector<8x128xf32>, vector<8x128xf32> -> vector<16x128xf32>
    %166 = vector.extract_strided_slice %165 {offsets = [0, 0], sizes = [16, 96], strides = [1, 1]} : vector<16x128xf32> to vector<16x96xf32>
    %167 = arith.negf %166 : vector<16x96xf32>
    %168 = math.exp %167 : vector<16x96xf32>
    %cst_55 = arith.constant 1.000000e+00 : f32
    %169 = vector.broadcast %cst_55 : f32 to vector<16x96xf32>
    %170 = arith.addf %169, %168 : vector<16x96xf32>
    %171 = arith.divf %169, %170 : vector<16x96xf32>
    %172 = vector.extract_strided_slice %171 {offsets = [0, 0], sizes = [16, 32], strides = [1, 1]} : vector<16x96xf32> to vector<16x32xf32>
    %173 = vector.extract_strided_slice %171 {offsets = [0, 32], sizes = [16, 32], strides = [1, 1]} : vector<16x96xf32> to vector<16x32xf32>
    %174 = vector.extract_strided_slice %171 {offsets = [0, 64], sizes = [16, 32], strides = [1, 1]} : vector<16x96xf32> to vector<16x32xf32>
    %175 = vector.extract_strided_slice %165 {offsets = [0, 96], sizes = [16, 32], strides = [1, 1]} : vector<16x128xf32> to vector<16x32xf32>
    %176 = math.tanh %175 : vector<16x32xf32>
    %177 = arith.mulf %173, %151 : vector<16x32xf32>
    %178 = arith.mulf %172, %176 : vector<16x32xf32>
    %179 = arith.addf %177, %178 : vector<16x32xf32>
    %180 = math.tanh %179 : vector<16x32xf32>
    %181 = arith.mulf %174, %180 : vector<16x32xf32>
    %182 = vector.extract_strided_slice %181 {offsets = [0, 0], sizes = [8, 32], strides = [1, 1]} : vector<16x32xf32> to vector<8x32xf32>
    %183 = vector.extract_strided_slice %181 {offsets = [8, 0], sizes = [8, 32], strides = [1, 1]} : vector<16x32xf32> to vector<8x32xf32>
    %cst_56 = arith.constant dense<0.000000e+00> : vector<16x256xf32>
    %184 = tpu.matmul %181, %13, %cst_56 {dimension_numbers = #tpu.dot_dimension_numbers<[1], [0], [0], [1], [0, 0, 1, 1], [], []>} : vector<16x32xf32>, vector<32x256xf32>, vector<16x256xf32> -> vector<16x256xf32>
    %c6_57 = arith.constant 6 : index
    %c0_58 = arith.constant 0 : index
    %c0_59 = arith.constant 0 : index
    %185 = vector.load %arg9[%c6_57, %c0_58, %c0_59] : memref<8x16x128xf32, #tpu.memory_space<vmem>>, vector<1x8x128xf32>
    %186 = vector.shape_cast %185 : vector<1x8x128xf32> to vector<8x128xf32>
    %187 = vector.extract_strided_slice %184 {offsets = [0, 0], sizes = [8, 128], strides = [1, 1]} : vector<16x256xf32> to vector<8x128xf32>
    %188 = arith.addf %186, %187 : vector<8x128xf32>
    %c1_60 = arith.constant 1 : index
    %c8_61 = arith.constant 8 : index
    %c0_62 = arith.constant 0 : index
    %189 = vector.load %arg9[%c1_60, %c8_61, %c0_62] : memref<8x16x128xf32, #tpu.memory_space<vmem>>, vector<1x8x128xf32>
    %190 = vector.shape_cast %189 : vector<1x8x128xf32> to vector<8x128xf32>
    %191 = vector.extract_strided_slice %184 {offsets = [8, 128], sizes = [8, 128], strides = [1, 1]} : vector<16x256xf32> to vector<8x128xf32>
    %192 = arith.addf %190, %191 : vector<8x128xf32>
    %193 = tpu.concatenate %188, %192 in 0 : vector<8x128xf32>, vector<8x128xf32> -> vector<16x128xf32>
    %194 = vector.extract_strided_slice %193 {offsets = [0, 0], sizes = [16, 96], strides = [1, 1]} : vector<16x128xf32> to vector<16x96xf32>
    %195 = arith.negf %194 : vector<16x96xf32>
    %196 = math.exp %195 : vector<16x96xf32>
    %cst_63 = arith.constant 1.000000e+00 : f32
    %197 = vector.broadcast %cst_63 : f32 to vector<16x96xf32>
    %198 = arith.addf %197, %196 : vector<16x96xf32>
    %199 = arith.divf %197, %198 : vector<16x96xf32>
    %200 = vector.extract_strided_slice %199 {offsets = [0, 0], sizes = [16, 32], strides = [1, 1]} : vector<16x96xf32> to vector<16x32xf32>
    %201 = vector.extract_strided_slice %199 {offsets = [0, 32], sizes = [16, 32], strides = [1, 1]} : vector<16x96xf32> to vector<16x32xf32>
    %202 = vector.extract_strided_slice %199 {offsets = [0, 64], sizes = [16, 32], strides = [1, 1]} : vector<16x96xf32> to vector<16x32xf32>
    %203 = vector.extract_strided_slice %193 {offsets = [0, 96], sizes = [16, 32], strides = [1, 1]} : vector<16x128xf32> to vector<16x32xf32>
    %204 = math.tanh %203 : vector<16x32xf32>
    %205 = arith.mulf %201, %179 : vector<16x32xf32>
    %206 = arith.mulf %200, %204 : vector<16x32xf32>
    %207 = arith.addf %205, %206 : vector<16x32xf32>
    %208 = math.tanh %207 : vector<16x32xf32>
    %209 = arith.mulf %202, %208 : vector<16x32xf32>
    %210 = vector.extract_strided_slice %209 {offsets = [0, 0], sizes = [8, 32], strides = [1, 1]} : vector<16x32xf32> to vector<8x32xf32>
    %211 = vector.extract_strided_slice %209 {offsets = [8, 0], sizes = [8, 32], strides = [1, 1]} : vector<16x32xf32> to vector<8x32xf32>
    %cst_64 = arith.constant dense<0.000000e+00> : vector<16x256xf32>
    %212 = tpu.matmul %209, %13, %cst_64 {dimension_numbers = #tpu.dot_dimension_numbers<[1], [0], [0], [1], [0, 0, 1, 1], [], []>} : vector<16x32xf32>, vector<32x256xf32>, vector<16x256xf32> -> vector<16x256xf32>
    %c7_65 = arith.constant 7 : index
    %c0_66 = arith.constant 0 : index
    %c0_67 = arith.constant 0 : index
    %213 = vector.load %arg9[%c7_65, %c0_66, %c0_67] : memref<8x16x128xf32, #tpu.memory_space<vmem>>, vector<1x8x128xf32>
    %214 = vector.shape_cast %213 : vector<1x8x128xf32> to vector<8x128xf32>
    %215 = vector.extract_strided_slice %212 {offsets = [0, 0], sizes = [8, 128], strides = [1, 1]} : vector<16x256xf32> to vector<8x128xf32>
    %216 = arith.addf %214, %215 : vector<8x128xf32>
    %c0_68 = arith.constant 0 : index
    %c8_69 = arith.constant 8 : index
    %c0_70 = arith.constant 0 : index
    %217 = vector.load %arg9[%c0_68, %c8_69, %c0_70] : memref<8x16x128xf32, #tpu.memory_space<vmem>>, vector<1x8x128xf32>
    %218 = vector.shape_cast %217 : vector<1x8x128xf32> to vector<8x128xf32>
    %219 = vector.extract_strided_slice %212 {offsets = [8, 128], sizes = [8, 128], strides = [1, 1]} : vector<16x256xf32> to vector<8x128xf32>
    %220 = arith.addf %218, %219 : vector<8x128xf32>
    %221 = tpu.concatenate %216, %220 in 0 : vector<8x128xf32>, vector<8x128xf32> -> vector<16x128xf32>
    %222 = vector.extract_strided_slice %221 {offsets = [0, 0], sizes = [16, 96], strides = [1, 1]} : vector<16x128xf32> to vector<16x96xf32>
    %223 = arith.negf %222 : vector<16x96xf32>
    %224 = math.exp %223 : vector<16x96xf32>
    %cst_71 = arith.constant 1.000000e+00 : f32
    %225 = vector.broadcast %cst_71 : f32 to vector<16x96xf32>
    %226 = arith.addf %225, %224 : vector<16x96xf32>
    %227 = arith.divf %225, %226 : vector<16x96xf32>
    %228 = vector.extract_strided_slice %227 {offsets = [0, 0], sizes = [16, 32], strides = [1, 1]} : vector<16x96xf32> to vector<16x32xf32>
    %229 = vector.extract_strided_slice %227 {offsets = [0, 32], sizes = [16, 32], strides = [1, 1]} : vector<16x96xf32> to vector<16x32xf32>
    %230 = vector.extract_strided_slice %227 {offsets = [0, 64], sizes = [16, 32], strides = [1, 1]} : vector<16x96xf32> to vector<16x32xf32>
    %231 = vector.extract_strided_slice %221 {offsets = [0, 96], sizes = [16, 32], strides = [1, 1]} : vector<16x128xf32> to vector<16x32xf32>
    %232 = math.tanh %231 : vector<16x32xf32>
    %233 = arith.mulf %229, %207 : vector<16x32xf32>
    %234 = arith.mulf %228, %232 : vector<16x32xf32>
    %235 = arith.addf %233, %234 : vector<16x32xf32>
    %236 = math.tanh %235 : vector<16x32xf32>
    %237 = arith.mulf %230, %236 : vector<16x32xf32>
    %238 = vector.extract_strided_slice %237 {offsets = [0, 0], sizes = [8, 32], strides = [1, 1]} : vector<16x32xf32> to vector<8x32xf32>
    %239 = vector.extract_strided_slice %237 {offsets = [8, 0], sizes = [8, 32], strides = [1, 1]} : vector<16x32xf32> to vector<8x32xf32>
    %240 = vector.shape_cast %42 : vector<8x32xf32> to vector<1x8x32xf32>
    %241 = vector.shape_cast %70 : vector<8x32xf32> to vector<1x8x32xf32>
    %242 = vector.shape_cast %98 : vector<8x32xf32> to vector<1x8x32xf32>
    %243 = vector.shape_cast %126 : vector<8x32xf32> to vector<1x8x32xf32>
    %244 = vector.shape_cast %154 : vector<8x32xf32> to vector<1x8x32xf32>
    %245 = vector.shape_cast %182 : vector<8x32xf32> to vector<1x8x32xf32>
    %246 = vector.shape_cast %210 : vector<8x32xf32> to vector<1x8x32xf32>
    %247 = vector.shape_cast %238 : vector<8x32xf32> to vector<1x8x32xf32>
    %248 = tpu.concatenate %240, %241, %242, %243, %244, %245, %246, %247 in 0 : vector<1x8x32xf32>, vector<1x8x32xf32>, vector<1x8x32xf32>, vector<1x8x32xf32>, vector<1x8x32xf32>, vector<1x8x32xf32>, vector<1x8x32xf32>, vector<1x8x32xf32> -> vector<8x8x32xf32>
    %c0_72 = arith.constant 0 : index
    %c0_73 = arith.constant 0 : index
    %c0_74 = arith.constant 0 : index
    %249 = vector.load %arg7[%c0_72, %c0_73, %c0_74] : memref<8x8x64xf32, #tpu.memory_space<vmem>>, vector<8x8x32xf32>
    tpu.vector_store %arg7[%c0_72, %c0_73, %c0_74], %248 {strides = array<i32>} : memref<8x8x64xf32, #tpu.memory_space<vmem>>, vector<8x8x32xf32>,
    %250 = vector.shape_cast %239 : vector<8x32xf32> to vector<1x8x32xf32>
    %251 = vector.shape_cast %211 : vector<8x32xf32> to vector<1x8x32xf32>
    %252 = vector.shape_cast %183 : vector<8x32xf32> to vector<1x8x32xf32>
    %253 = vector.shape_cast %155 : vector<8x32xf32> to vector<1x8x32xf32>
    %254 = vector.shape_cast %127 : vector<8x32xf32> to vector<1x8x32xf32>
    %255 = vector.shape_cast %99 : vector<8x32xf32> to vector<1x8x32xf32>
    %256 = vector.shape_cast %71 : vector<8x32xf32> to vector<1x8x32xf32>
    %257 = vector.shape_cast %43 : vector<8x32xf32> to vector<1x8x32xf32>
    %258 = tpu.concatenate %250, %251, %252, %253, %254, %255, %256, %257 in 0 : vector<1x8x32xf32>, vector<1x8x32xf32>, vector<1x8x32xf32>, vector<1x8x32xf32>, vector<1x8x32xf32>, vector<1x8x32xf32>, vector<1x8x32xf32>, vector<1x8x32xf32> -> vector<8x8x32xf32>
    %c0_75 = arith.constant 0 : index
    %c0_76 = arith.constant 0 : index
    %c32 = arith.constant 32 : index
    %259 = vector.load %arg7[%c0_75, %c0_76, %c32] : memref<8x8x64xf32, #tpu.memory_space<vmem>>, vector<8x8x32xf32>
    tpu.vector_store %arg7[%c0_75, %c0_76, %c32], %258 {strides = array<i32>} : memref<8x8x64xf32, #tpu.memory_space<vmem>>, vector<8x8x32xf32>,
    %260 = vector.extract_strided_slice %237 {offsets = [0, 0], sizes = [8, 32], strides = [1, 1]} : vector<16x32xf32> to vector<8x32xf32>
    %261 = vector.extract_strided_slice %237 {offsets = [8, 0], sizes = [8, 32], strides = [1, 1]} : vector<16x32xf32> to vector<8x32xf32>
    %262 = vector.extract_strided_slice %235 {offsets = [0, 0], sizes = [8, 32], strides = [1, 1]} : vector<16x32xf32> to vector<8x32xf32>
    %263 = vector.extract_strided_slice %235 {offsets = [8, 0], sizes = [8, 32], strides = [1, 1]} : vector<16x32xf32> to vector<8x32xf32>
    %c0_77 = arith.constant 0 : index
    %c0_78 = arith.constant 0 : index
    %c0_79 = arith.constant 0 : index
    %264 = vector.load %arg4[%c0_77, %c0_78, %c0_79] : memref<2x32x32xf32, #tpu.memory_space<vmem>>, vector<2x32x32xf32>
    %c0_80 = arith.constant 0 : index
    %c0_81 = arith.constant 0 : index
    %c0_82 = arith.constant 0 : index
    %265 = vector.load %arg5[%c0_80, %c0_81, %c0_82] : memref<2x32x32xf32, #tpu.memory_space<vmem>>, vector<2x32x32xf32>
    %266 = vector.extract_strided_slice %264 {offsets = [0, 0, 0], sizes = [1, 32, 32], strides = [1, 1, 1]} : vector<2x32x32xf32> to vector<1x32x32xf32>
    %267 = vector.shape_cast %266 : vector<1x32x32xf32> to vector<32x32xf32>
    %cst_83 = arith.constant dense<0.000000e+00> : vector<8x32xf32>
    %268 = tpu.matmul %260, %267, %cst_83 {dimension_numbers = #tpu.dot_dimension_numbers<[1], [0], [0], [1], [0, 0, 1, 1], [], []>} : vector<8x32xf32>, vector<32x32xf32>, vector<8x32xf32> -> vector<8x32xf32>
    %269 = vector.extract_strided_slice %265 {offsets = [0, 0, 0], sizes = [1, 32, 32], strides = [1, 1, 1]} : vector<2x32x32xf32> to vector<1x32x32xf32>
    %270 = vector.shape_cast %269 : vector<1x32x32xf32> to vector<32x32xf32>
    %cst_84 = arith.constant dense<0.000000e+00> : vector<8x32xf32>
    %271 = tpu.matmul %261, %270, %cst_84 {dimension_numbers = #tpu.dot_dimension_numbers<[1], [0], [0], [1], [0, 0, 1, 1], [], []>} : vector<8x32xf32>, vector<32x32xf32>, vector<8x32xf32> -> vector<8x32xf32>
    %272 = arith.addf %268, %271 : vector<8x32xf32>
    %c0_85 = arith.constant 0 : index
    %c0_86 = arith.constant 0 : index
    %c0_87 = arith.constant 0 : index
    %273 = vector.load %arg6[%c0_85, %c0_86, %c0_87] : memref<2x1x32xf32, #tpu.memory_space<vmem>>, vector<1x1x32xf32>
    %274 = vector.shape_cast %273 : vector<1x1x32xf32> to vector<1x32xf32>
    %275 = vector.broadcast %274 : vector<1x32xf32> to vector<8x32xf32>
    %276 = arith.addf %272, %275 : vector<8x32xf32>
    %c0_88 = arith.constant 0 : index
    %c0_89 = arith.constant 0 : index
    %c0_90 = arith.constant 0 : index
    %277 = vector.load %arg8[%c0_88, %c0_89, %c0_90] : memref<2x8x32xf32, #tpu.memory_space<vmem>>, vector<1x8x32xf32>
    %278 = vector.shape_cast %277 : vector<1x8x32xf32> to vector<8x32xf32>
    %279 = vector.shape_cast %276 : vector<8x32xf32> to vector<1x8x32xf32>
    tpu.vector_store %arg8[%c0_88, %c0_89, %c0_90], %279 {strides = array<i32>} : memref<2x8x32xf32, #tpu.memory_space<vmem>>, vector<1x8x32xf32>,
    %280 = vector.extract_strided_slice %264 {offsets = [1, 0, 0], sizes = [1, 32, 32], strides = [1, 1, 1]} : vector<2x32x32xf32> to vector<1x32x32xf32>
    %281 = vector.shape_cast %280 : vector<1x32x32xf32> to vector<32x32xf32>
    %cst_91 = arith.constant dense<0.000000e+00> : vector<8x32xf32>
    %282 = tpu.matmul %262, %281, %cst_91 {dimension_numbers = #tpu.dot_dimension_numbers<[1], [0], [0], [1], [0, 0, 1, 1], [], []>} : vector<8x32xf32>, vector<32x32xf32>, vector<8x32xf32> -> vector<8x32xf32>
    %283 = vector.extract_strided_slice %265 {offsets = [1, 0, 0], sizes = [1, 32, 32], strides = [1, 1, 1]} : vector<2x32x32xf32> to vector<1x32x32xf32>
    %284 = vector.shape_cast %283 : vector<1x32x32xf32> to vector<32x32xf32>
    %cst_92 = arith.constant dense<0.000000e+00> : vector<8x32xf32>
    %285 = tpu.matmul %263, %284, %cst_92 {dimension_numbers = #tpu.dot_dimension_numbers<[1], [0], [0], [1], [0, 0, 1, 1], [], []>} : vector<8x32xf32>, vector<32x32xf32>, vector<8x32xf32> -> vector<8x32xf32>
    %286 = arith.addf %282, %285 : vector<8x32xf32>
    %c1_93 = arith.constant 1 : index
    %c0_94 = arith.constant 0 : index
    %c0_95 = arith.constant 0 : index
    %287 = vector.load %arg6[%c1_93, %c0_94, %c0_95] : memref<2x1x32xf32, #tpu.memory_space<vmem>>, vector<1x1x32xf32>
    %288 = vector.shape_cast %287 : vector<1x1x32xf32> to vector<1x32xf32>
    %289 = vector.broadcast %288 : vector<1x32xf32> to vector<8x32xf32>
    %290 = arith.addf %286, %289 : vector<8x32xf32>
    %c1_96 = arith.constant 1 : index
    %c0_97 = arith.constant 0 : index
    %c0_98 = arith.constant 0 : index
    %291 = vector.load %arg8[%c1_96, %c0_97, %c0_98] : memref<2x8x32xf32, #tpu.memory_space<vmem>>, vector<1x8x32xf32>
    %292 = vector.shape_cast %291 : vector<1x8x32xf32> to vector<8x32xf32>
    %293 = vector.shape_cast %290 : vector<8x32xf32> to vector<1x8x32xf32>
    tpu.vector_store %arg8[%c1_96, %c0_97, %c0_98], %293 {strides = array<i32>} : memref<2x8x32xf32, #tpu.memory_space<vmem>>, vector<1x8x32xf32>,
    return
  }
}

</mosaic_0001>

<bundles_post_ra>
// kernel: encoder_att_forward.1
= control target key start
LH: loop header
LB: loop body
LE: loop exit
PB: predicated region body
PF: predicated region fallthrough
CT: control target
= control target key end

     0   :  { %v2047_v3 = vmov 0.0   ;;  %vm56_vm0 = vcmask 261120   ;;  %v46_v33 = vlaneseq  ;;  %vm2051_vm1 = vmmov 0   ;;  %s2052_s13 = smov 96   ;;  %s2541_s1 = inlined_call_operand.vmem [shape: f32[32,256], index: 1, kind: input, shape index: {}]   ;;  %s2542_s3 = inlined_call_operand.vmem [shape: f32[32,256], index: 3, kind: input, shape index: {}]   ;;  %s2543_s0 = inlined_call_operand.vmem [shape: f32[8,8,32], index: 0, kind: input, shape index: {}]   ;;  %s2544_s2 = inlined_call_operand.vmem [shape: f32[1,256], index: 2, kind: input, shape index: {}]   ;;  %s2545_s7 = inlined_call_operand.vmem [shape: f32[8,8,64], index: 7, kind: output, shape index: {0}]   ;;  %s2546_s4 = inlined_call_operand.vmem [shape: f32[2,32,32], index: 4, kind: input, shape index: {}]   ;;  %s2547_s5 = inlined_call_operand.vmem [shape: f32[2,32,32], index: 5, kind: input, shape index: {}]   ;;  %s2548_s6 = inlined_call_operand.vmem [shape: f32[2,1,32], index: 6, kind: input, shape index: {}]   ;;  %s2549_s8 = inlined_call_operand.vmem [shape: f32[2,8,32], index: 8, kind: output, shape index: {1}]  }
   0x1   :  { %v37_v0 = vld [vmem:[%s2541_s1 + $0x8] sm:$0xff]  ;;  %v39_v1 = vld [vmem:[%s2541_s1 + $0x18] sm:$0xff]  ;;  %v36_v2 = vld [vmem:[%s2541_s1] sm:$0xff]  ;;  %145 = vmatprep.mubr.f32.mxu0 %v2047_v3  ;;  %285 = vmatprep.mubr.f32.mxu1 %v2047_v3  ;;  %vm1358_vm2 = vcmask 523520  }
   0x2   :  { %v1817_v4 = vpack.c.bf16 %v39_v1, %v37_v0  ;;  %v38_v5 = vld [vmem:[%s2541_s1 + $0x10] sm:$0xff]  ;;  %v211_v6 = vld [vmem:[%s2542_s3 + $0x8] sm:$0xff]  ;;  %v213_v7 = vld [vmem:[%s2542_s3 + $0x18] sm:$0xff]  ;;  %v47_v34 = vshrl.u32 %v46_v33, 7 }
   0x3   :  { %v1819_v8 = vpack.c.bf16 %v38_v5, %v36_v2  ;;  %v2118_v9 = vpack.c.bf16 %v213_v7, %v211_v6  ;;  %v210_v10 = vld [vmem:[%s2542_s3] sm:$0xff]  ;;  %v212_v11 = vld [vmem:[%s2542_s3 + $0x10] sm:$0xff]  ;;  %v41_v12 = vld [vmem:[%s2541_s1 + $0x28] sm:$0xff] }
   0x4   :  { %1818 = vmatprep.subr.bf16.mxu0 %v1817_v4  ;;  %v2129_v13 = vpack.c.bf16 %v212_v11, %v210_v10  ;;  %v43_v14 = vld [vmem:[%s2541_s1 + $0x38] sm:$0xff]  ;;  %v40_v15 = vld [vmem:[%s2541_s1 + $0x20] sm:$0xff]  ;;  %v42_v16 = vld [vmem:[%s2541_s1 + $0x30] sm:$0xff]  ;;  %v48_v35 = vsub.s32 0, %v47_v34  ;;  %v52_v37 = vsub.s32 1, %v47_v34 }
   0x5   :  { %1820 = vmatpush1.bf16.msra.mxu0 %v1819_v8  ;;  %1826 = vmatprep.subr.bf16.mxu1 %v2118_v9  ;;  %v1821_v17 = vpack.c.bf16 %v43_v14, %v41_v12  ;;  %v1823_v18 = vpack.c.bf16 %v42_v16, %v40_v15  ;;  %v215_v19 = vld [vmem:[%s2542_s3 + $0x28] sm:$0xff]  ;;  %v217_v20 = vld [vmem:[%s2542_s3 + $0x38] sm:$0xff]  ;;  %v214_v21 = vld [vmem:[%s2542_s3 + $0x20] sm:$0xff] }
   0x6   :  { %1828 = vmatpush1.bf16.msra.mxu1 %v2129_v13  ;;  %v2151_v22 = vpack.c.bf16 %v217_v20, %v215_v19  ;;  %v216_v23 = vld [vmem:[%s2542_s3 + $0x30] sm:$0xff]  ;;  %v28_v25 = vld [vmem:[%s2543_s0] sm:$0xff]  ;;  %v29_v26 = vld [vmem:[%s2543_s0 + $0x8] sm:$0xff] }
   0x7   :  { %1822 = vmatprep.subr.bf16.mxu0 %v1821_v17  ;;  %v2156_v24 = vpack.c.bf16 %v216_v23, %v214_v21  ;;  %v30_v27 = vld [vmem:[%s2543_s0 + $0x10] sm:$0xff]  ;;  %v31_v28 = vld [vmem:[%s2543_s0 + $0x18] sm:$0xff]  ;;  %v32_v29 = vld [vmem:[%s2543_s0 + $0x20] sm:$0xff] }
   0x8   :  { %1830 = vmatprep.subr.bf16.mxu1 %v2151_v22  ;;  %v33_v30 = vld [vmem:[%s2543_s0 + $0x28] sm:$0xff]  ;;  %v34_v31 = vld [vmem:[%s2543_s0 + $0x30] sm:$0xff]  ;;  %v35_v32 = vld [vmem:[%s2543_s0 + $0x38] sm:$0xff]  ;;  %s2048_s0 = smov 32  }
   0x9   :  { %1824 = vmatpush1.bf16.msra.mxu0 %v1823_v18  ;;  %v44_v36 = vld [vmem:[%s2544_s2] sm:$0x3]  ;;  %s2049_s2 = smov 64  }
   0xa   :  { %1832 = vmatpush1.bf16.msra.mxu1 %v2156_v24  ;;  %1858 = vmatprep.subr.bf16.mxu0 %v2118_v9  ;;  %v49_v38 = vrot.slane %v44_v36, %v48_v35  ;;  %v53_v39 = vrot.slane %v44_v36, %v52_v37 }
   0xb   :  { %1834 = vmatprep.subr.bf16.mxu1 %v2118_v9 }
   0xc   :  { %1707 = vmatmul.mubr.msk.f32.vlgmr.msra.gmra.mrb[0].mxu0 %vm56_vm0, %v28_v25 }
   0xd   :  { %286 = vmatmul.mubr.f32.vlgmr.msra.gmra.mrb[0].mxu1 %v2047_v3  ;;  %151 = vmatprep.mubr.f32.mxu0 %v2047_v3 }
   0xe   :  { %290 = vmatprep.mubr.f32.mxu1 %v2047_v3  ;;  %1836 = vmatpush1.bf16.msra.mxu1 %v2129_v13 }
   0xf   :  { %1838 = vmatprep.subr.bf16.mxu1 %v2151_v22  ;;  %1860 = vmatpush1.bf16.msra.mxu0 %v2129_v13 }
  0x10   :  { %1708 = vmatmul.mubr.msk.f32.gmra.mrb[2].mxu0 %vm56_vm0, %v29_v26  ;;  %1862 = vmatprep.subr.bf16.mxu0 %v2151_v22 }
  0x11   :  { %157 = vmatprep.mubr.f32.mxu0 %v2047_v3  ;;  %291 = vmatmul.mubr.f32.gmra.mrb[2].mxu1 %v2047_v3 }
  0x12   :  { %1840 = vmatpush1.bf16.msra.mxu1 %v2156_v24  ;;  %423 = vmatprep.mubr.f32.mxu1 %v2047_v3 }
  0x13   :  { %1842 = vmatprep.subr.bf16.mxu1 %v2118_v9  ;;  %1864 = vmatpush1.bf16.msra.mxu0 %v2156_v24 }
  0x14   :  { %1709 = vmatmul.mubr.msk.f32.gmra.mrb[4].mxu0 %vm56_vm0, %v30_v27  ;;  %1874 = vmatprep.subr.bf16.mxu0 %v2118_v9 }
  0x15   :  { %163 = vmatprep.mubr.f32.mxu0 %v2047_v3 }
  0x18   :  { %1710 = vmatmul.mubr.msk.f32.gmra.mrb[6].mxu0 %vm56_vm0, %v31_v28 }
  0x19   :  { %169 = vmatprep.mubr.f32.mxu0 %v2047_v3 }
  0x1c   :  { %1711 = vmatmul.mubr.msk.f32.gmra.mrb[8].mxu0 %vm56_vm0, %v32_v29 }
  0x1d   :  { %175 = vmatprep.mubr.f32.mxu0 %v2047_v3 }
  0x20   :  { %1712 = vmatmul.mubr.msk.f32.gmra.mrb[10].mxu0 %vm56_vm0, %v33_v30 }
  0x21   :  { %181 = vmatprep.mubr.f32.mxu0 %v2047_v3 }
  0x24   :  { %1713 = vmatmul.mubr.msk.f32.gmra.mrb[12].mxu0 %vm56_vm0, %v34_v31 }
  0x25   :  { %187 = vmatprep.mubr.f32.mxu0 %v2047_v3 }
  0x28   :  { %1714 = vmatmul.mubr.msk.f32.gmra.mrb[14].mxu0 %vm56_vm0, %v35_v32 }
  0x29   :  { %840 = vmatprep.mubr.f32.mxu0 %v2047_v3 }
  0xdf   :  { %v147_v40 = vpop.f32.mrb[0].mxu0 }
  0xe0   :  { %v148_v41 = vadd.f32 %v147_v40, %v49_v38  ;;  %v149_v42 = vpop.f32.mrb[1].mxu0  ;;  %v287_v43 = vpop.f32.mrb[0].mxu1 }
  0xe1   :  { %v2217_v44 = vadd.f32 %v149_v42, %v53_v39  ;;  %v289_v45 = vpop.f32.mrb[1].mxu1 }
  0xe2   :  { %v297_v46 = vadd.f32 %v287_v43, %v148_v41 }
  0xe3   :  { %v153_v47 = vpop.f32.mrb[2].mxu0 }
  0xe4   :  { %1919 = vtanh.f32 %v297_v46  ;;  %v2219_v48 = vadd.f32 %v153_v47, %v49_v38  ;;  %v155_v49 = vpop.f32.mrb[3].mxu0  ;;  %v292_v50 = vpop.f32.mrb[2].mxu1  ;;  %v1715_v19 = vmul.f32 -1.442695, %v297_v46 }
  0xe5   :  { %v2221_v51 = vadd.f32 %v155_v49, %v53_v39  ;;  %v293_v52 = vpop.f32.mrb[3].mxu1 }
  0xe7   :  { %v159_v53 = vpop.f32.mrb[4].mxu0 }
  0xe8   :  { %v2223_v54 = vadd.f32 %v159_v53, %v49_v38  ;;  %v161_v55 = vpop.f32.mrb[5].mxu0 }
  0xe9   :  { %v2225_v56 = vadd.f32 %v161_v55, %v53_v39 }
  0xeb   :  { %v165_v57 = vpop.f32.mrb[6].mxu0 }
  0xec   :  { %v2227_v58 = vadd.f32 %v165_v57, %v49_v38  ;;  %v167_v59 = vpop.f32.mrb[7].mxu0 }
  0xed   :  { %v2229_v60 = vadd.f32 %v167_v59, %v53_v39 }
  0xee   :  { %v1920_v61 = vpop.eup %1919 }
  0xef   :  { %v171_v62 = vpop.f32.mrb[8].mxu0  ;;  %319 = vrot.lane.b32.xlu0 %v1920_v61, %s2048_s0 }
  0xf0   :  { %v2232_v63 = vadd.f32 %v171_v62, %v49_v38  ;;  %v173_v0 = vpop.f32.mrb[9].mxu0 }
  0xf1   :  { %v2234_v1 = vadd.f32 %v173_v0, %v53_v39 }
  0xf3   :  { %v177_v2 = vpop.f32.mrb[10].mxu0 }
  0xf4   :  { %v2236_v4 = vadd.f32 %v177_v2, %v49_v38  ;;  %v179_v5 = vpop.f32.mrb[11].mxu0 }
  0xf5   :  { %v2238_v6 = vadd.f32 %v179_v5, %v53_v39 }
  0xf7   :  { %v183_v7 = vpop.f32.mrb[12].mxu0 }
  0xf8   :  { %v2240_v8 = vadd.f32 %v183_v7, %v49_v38  ;;  %v185_v10 = vpop.f32.mrb[13].mxu0 }
  0xf9   :  { %v2242_v11 = vadd.f32 %v185_v10, %v53_v39 }
  0xfb   :  { %v189_v12 = vpop.f32.mrb[14].mxu0 }
  0xfc   :  { %v2244_v14 = vadd.f32 %v189_v12, %v49_v38  ;;  %v191_v15 = vpop.f32.mrb[15].mxu0 }
  0xfd   :  { %v192_v16 = vadd.f32 %v191_v15, %v53_v39 }
  0xff   :  { %v300_v17 = vadd.f32 %v293_v52, %v192_v16 }
 0x101   :  { %1921 = vtanh.f32 %v300_v17  ;;  %v1716_v23 = vmul.f32 -1.442695, %v300_v17 }
 0x102   :  { %1923 = vpow2.f32 %v1715_v19 }
 0x10b   :  { %v1922_v18 = vpop.eup %1921 }
 0x10c   :  { %321 = vrot.lane.b32.xlu0 %v1922_v18, %s2048_s0  ;;  %v1924_v20 = vpop.eup %1923 }
 0x10d   :  { %v307_v21 = vadd.f32 1.0, %v1924_v20 }
 0x10f   :  { %1925 = vrcp.f32 %v307_v21 }
 0x110   :  { %1927 = vpow2.f32 %v1716_v23 }
 0x119   :  { %v1926_v25 = vpop.eup %1925 }
 0x11a   :  { %v1928_v28 = vpop.eup %1927  ;;  %v315_v33 = vmul.f32 0.0, %v1926_v25 }
 0x11b   :  { %v308_v29 = vadd.f32 1.0, %v1928_v28 }
 0x11d   :  { %1929 = vrcp.f32 %v308_v29 }
 0x127   :  { %v1930_v30 = vpop.eup %1929 }
 0x128   :  { %v316_v37 = vmul.f32 0.0, %v1930_v30 }
 0x161   :  { %v320_v26 = vpop.permute.xlu0 %319 }
 0x162   :  { %v325_v27 = vmul.f32 %v1926_v25, %v320_v26 }
 0x164   :  { %329 = vrot.lane.b32.xlu1 %v325_v27, %s2048_s0 }
 0x17e   :  { %v322_v31 = vpop.permute.xlu0 %321 }
 0x17f   :  { %v326_v32 = vmul.f32 %v1930_v30, %v322_v31 }
 0x181   :  { %331 = vrot.lane.b32.xlu1 %v326_v32, %s2048_s0 }
 0x1d6   :  { %v330_v34 = vpop.permute.xlu1 %329 }
 0x1d7   :  { %v335_v35 = vadd.f32 %v330_v34, %v315_v33 }
 0x1d9   :  { %1931 = vtanh.f32 %v335_v35 }
 0x1e3   :  { %v1932_v36 = vpop.eup %1931 }
 0x1e4   :  { %341 = vrot.lane.b32.xlu0 %v1932_v36, %s2048_s0 }
 0x1f3   :  { %v332_v38 = vpop.permute.xlu1 %331 }
 0x1f4   :  { %v336_v39 = vadd.f32 %v332_v38, %v316_v37 }
 0x1f6   :  { %1933 = vtanh.f32 %v336_v39 }
 0x200   :  { %v1934_v40 = vpop.eup %1933 }
 0x201   :  { %343 = vrot.lane.b32.xlu1 %v1934_v40, %s2048_s0 }
 0x256   :  { %v342_v41 = vpop.permute.xlu0 %341 }
 0x257   :  { %v347_v42 = vmul.f32 %v1926_v25, %v342_v41 }
 0x259   :  { %351 = vrot.lane.b32.xlu0 %v347_v42, %s2049_s2 }
 0x273   :  { %v344_v43 = vpop.permute.xlu1 %343 }
 0x274   :  { %v2252_v45 = vmul.f32 %v1930_v30, %v344_v43 }
 0x276   :  { %353 = vrot.lane.b32.xlu1 %v2252_v45, %s2049_s2 }
 0x2cb   :  { %v352_v46 = vpop.permute.xlu0 %351 }
 0x2cc   :  { %1325 = vst.msk [vmem:[%s2545_s7] sm:$0xff] %vm56_vm0, %v352_v46  ;;  %1717 = vmatmul.mubr.msk.f32.vlgmr.msra.gmra.mrb[4].mxu1 %vm56_vm0, %v352_v46 }
 0x2cd   :  { %428 = vmatprep.mubr.f32.mxu1 %v2047_v3  ;;  %1844 = vmatpush1.bf16.msra.mxu1 %v2129_v13 }
 0x2ce   :  { %1846 = vmatprep.subr.bf16.mxu1 %v2151_v22 }
 0x2d1   :  { %1848 = vmatpush1.bf16.msra.mxu1 %v2156_v24 }
 0x2d2   :  { %1850 = vmatprep.subr.bf16.mxu1 %v2118_v9 }
 0x2e8   :  { %v354_v47 = vpop.permute.xlu1 %353 }
 0x2e9   :  { %1718 = vmatmul.mubr.msk.f32.gmra.mrb[6].mxu1 %vm56_vm0, %v354_v47 }
 0x2ea   :  { %562 = vmatprep.mubr.f32.mxu1 %v2047_v3 }
 0x39f   :  { %v425_v49 = vpop.f32.mrb[4].mxu1 }
 0x3a0   :  { %v436_v50 = vadd.f32 %v425_v49, %v2219_v48  ;;  %v427_v52 = vpop.f32.mrb[5].mxu1 }
 0x3a2   :  { %1935 = vtanh.f32 %v436_v50  ;;  %v1719_v62 = vmul.f32 -1.442695, %v436_v50 }
 0x3ac   :  { %v1936_v53 = vpop.eup %1935 }
 0x3ad   :  { %458 = vrot.lane.b32.xlu0 %v1936_v53, %s2048_s0 }
 0x3bc   :  { %v430_v55 = vpop.f32.mrb[6].mxu1 }
 0x3bd   :  { %v431_v57 = vpop.f32.mrb[7].mxu1 }
 0x3be   :  { %v439_v59 = vadd.f32 %v431_v57, %v2242_v11 }
 0x3c0   :  { %1937 = vtanh.f32 %v439_v59  ;;  %v1720_v5 = vmul.f32 -1.442695, %v439_v59 }
 0x3c1   :  { %1939 = vpow2.f32 %v1719_v62 }
 0x3ca   :  { %v1938_v61 = vpop.eup %1937 }
 0x3cb   :  { %460 = vrot.lane.b32.xlu1 %v1938_v61, %s2048_s0  ;;  %v1940_v0 = vpop.eup %1939 }
 0x3cc   :  { %v446_v2 = vadd.f32 1.0, %v1940_v0 }
 0x3ce   :  { %1941 = vrcp.f32 %v446_v2 }
 0x3cf   :  { %1943 = vpow2.f32 %v1720_v5 }
 0x3d8   :  { %v1942_v48 = vpop.eup %1941 }
 0x3d9   :  { %v1944_v12 = vpop.eup %1943  ;;  %v454_v18 = vmul.f32 %v1942_v48, %v335_v35 }
 0x3da   :  { %v447_v15 = vadd.f32 1.0, %v1944_v12 }
 0x3dc   :  { %1945 = vrcp.f32 %v447_v15 }
 0x3e6   :  { %v1946_v11 = vpop.eup %1945 }
 0x3e7   :  { %v455_v23 = vmul.f32 %v1946_v11, %v336_v39 }
 0x41f   :  { %v459_v7 = vpop.permute.xlu0 %458 }
 0x420   :  { %v464_v10 = vmul.f32 %v1942_v48, %v459_v7 }
 0x422   :  { %468 = vrot.lane.b32.xlu0 %v464_v10, %s2048_s0 }
 0x43d   :  { %v461_v16 = vpop.permute.xlu1 %460 }
 0x43e   :  { %v465_v17 = vmul.f32 %v1946_v11, %v461_v16 }
 0x440   :  { %470 = vrot.lane.b32.xlu1 %v465_v17, %s2048_s0 }
 0x494   :  { %v469_v19 = vpop.permute.xlu0 %468 }
 0x495   :  { %v474_v20 = vadd.f32 %v469_v19, %v454_v18 }
 0x497   :  { %1947 = vtanh.f32 %v474_v20 }
 0x4a1   :  { %v1948_v21 = vpop.eup %1947 }
 0x4a2   :  { %480 = vrot.lane.b32.xlu0 %v1948_v21, %s2048_s0 }
 0x4b2   :  { %v471_v25 = vpop.permute.xlu1 %470 }
 0x4b3   :  { %v475_v26 = vadd.f32 %v471_v25, %v455_v23 }
 0x4b5   :  { %1949 = vtanh.f32 %v475_v26 }
 0x4bf   :  { %v1950_v27 = vpop.eup %1949 }
 0x4c0   :  { %482 = vrot.lane.b32.xlu1 %v1950_v27, %s2048_s0 }
 0x514   :  { %v481_v28 = vpop.permute.xlu0 %480 }
 0x515   :  { %v486_v29 = vmul.f32 %v1942_v48, %v481_v28 }
 0x517   :  { %490 = vrot.lane.b32.xlu0 %v486_v29, %s2049_s2 }
 0x532   :  { %v483_v30 = vpop.permute.xlu1 %482 }
 0x533   :  { %v2277_v31 = vmul.f32 %v1946_v11, %v483_v30 }
 0x535   :  { %492 = vrot.lane.b32.xlu1 %v2277_v31, %s2049_s2 }
 0x589   :  { %v491_v32 = vpop.permute.xlu0 %490 }
 0x58a   :  { %1326 = vst.msk [vmem:[%s2545_s7 + $0x8] sm:$0xff] %vm56_vm0, %v491_v32  ;;  %1721 = vmatmul.mubr.msk.f32.vlgmr.msra.gmra.mrb[8].mxu1 %vm56_vm0, %v491_v32 }
 0x58b   :  { %567 = vmatprep.mubr.f32.mxu1 %v2047_v3  ;;  %1852 = vmatpush1.bf16.msra.mxu1 %v2129_v13 }
 0x58c   :  { %1854 = vmatprep.subr.bf16.mxu1 %v2151_v22 }
 0x58f   :  { %1856 = vmatpush1.bf16.msra.mxu1 %v2156_v24 }
 0x590   :  { %1866 = vmatprep.subr.bf16.mxu1 %v2118_v9 }
 0x5a7   :  { %v493_v33 = vpop.permute.xlu1 %492 }
 0x5a8   :  { %1722 = vmatmul.mubr.msk.f32.gmra.mrb[10].mxu1 %vm56_vm0, %v493_v33 }
 0x5a9   :  { %701 = vmatprep.mubr.f32.mxu1 %v2047_v3 }
 0x65d   :  { %v564_v34 = vpop.f32.mrb[8].mxu1 }
 0x65e   :  { %v575_v35 = vadd.f32 %v564_v34, %v2223_v54  ;;  %v566_v36 = vpop.f32.mrb[9].mxu1 }
 0x660   :  { %1951 = vtanh.f32 %v575_v35  ;;  %v1723_v42 = vmul.f32 -1.442695, %v575_v35 }
 0x66a   :  { %v1952_v37 = vpop.eup %1951 }
 0x66b   :  { %597 = vrot.lane.b32.xlu0 %v1952_v37, %s2048_s0 }
 0x67b   :  { %v569_v38 = vpop.f32.mrb[10].mxu1 }
 0x67c   :  { %v570_v39 = vpop.f32.mrb[11].mxu1 }
 0x67d   :  { %v578_v40 = vadd.f32 %v570_v39, %v2238_v6 }
 0x67f   :  { %1953 = vtanh.f32 %v578_v40  ;;  %v1724_v54 = vmul.f32 -1.442695, %v578_v40 }
 0x680   :  { %1955 = vpow2.f32 %v1723_v42 }
 0x689   :  { %v1954_v41 = vpop.eup %1953 }
 0x68a   :  { %599 = vrot.lane.b32.xlu1 %v1954_v41, %s2048_s0  ;;  %v1956_v43 = vpop.eup %1955 }
 0x68b   :  { %v585_v46 = vadd.f32 1.0, %v1956_v43 }
 0x68d   :  { %1957 = vrcp.f32 %v585_v46 }
 0x68e   :  { %1959 = vpow2.f32 %v1724_v54 }
 0x697   :  { %v1958_v47 = vpop.eup %1957 }
 0x698   :  { %v1960_v52 = vpop.eup %1959  ;;  %v593_v59 = vmul.f32 %v1958_v47, %v474_v20 }
 0x699   :  { %v586_v53 = vadd.f32 1.0, %v1960_v52 }
 0x69b   :  { %1961 = vrcp.f32 %v586_v53 }
 0x6a5   :  { %v1962_v6 = vpop.eup %1961 }
 0x6a6   :  { %v594_v2 = vmul.f32 %v1962_v6, %v475_v26 }
 0x6dd   :  { %v598_v49 = vpop.permute.xlu0 %597 }
 0x6de   :  { %v603_v50 = vmul.f32 %v1958_v47, %v598_v49 }
 0x6e0   :  { %607 = vrot.lane.b32.xlu0 %v603_v50, %s2048_s0 }
 0x6fc   :  { %v600_v55 = vpop.permute.xlu1 %599 }
 0x6fd   :  { %v604_v57 = vmul.f32 %v1962_v6, %v600_v55 }
 0x6ff   :  { %609 = vrot.lane.b32.xlu1 %v604_v57, %s2048_s0 }
 0x752   :  { %v608_v61 = vpop.permute.xlu0 %607 }
 0x753   :  { %v613_v62 = vadd.f32 %v608_v61, %v593_v59 }
 0x755   :  { %1963 = vtanh.f32 %v613_v62 }
 0x75f   :  { %v1964_v0 = vpop.eup %1963 }
 0x760   :  { %619 = vrot.lane.b32.xlu0 %v1964_v0, %s2048_s0 }
 0x771   :  { %v610_v5 = vpop.permute.xlu1 %609 }
 0x772   :  { %v614_v48 = vadd.f32 %v610_v5, %v594_v2 }
 0x774   :  { %1965 = vtanh.f32 %v614_v48 }
 0x77e   :  { %v1966_v7 = vpop.eup %1965 }
 0x77f   :  { %621 = vrot.lane.b32.xlu1 %v1966_v7, %s2048_s0 }
 0x7d2   :  { %v620_v10 = vpop.permute.xlu0 %619 }
 0x7d3   :  { %v625_v12 = vmul.f32 %v1958_v47, %v620_v10 }
 0x7d5   :  { %629 = vrot.lane.b32.xlu0 %v625_v12, %s2049_s2 }
 0x7f1   :  { %v622_v15 = vpop.permute.xlu1 %621 }
 0x7f2   :  { %v2302_v11 = vmul.f32 %v1962_v6, %v622_v15 }
 0x7f4   :  { %631 = vrot.lane.b32.xlu1 %v2302_v11, %s2049_s2 }
 0x847   :  { %v630_v16 = vpop.permute.xlu0 %629 }
 0x848   :  { %1327 = vst.msk [vmem:[%s2545_s7 + $0x10] sm:$0xff] %vm56_vm0, %v630_v16  ;;  %1725 = vmatmul.mubr.msk.f32.vlgmr.msra.gmra.mrb[12].mxu1 %vm56_vm0, %v630_v16 }
 0x849   :  { %706 = vmatprep.mubr.f32.mxu1 %v2047_v3  ;;  %1868 = vmatpush1.bf16.msra.mxu1 %v2129_v13 }
 0x84a   :  { %1870 = vmatprep.subr.bf16.mxu1 %v2151_v22 }
 0x84d   :  { %1872 = vmatpush1.bf16.msra.mxu1 %v2156_v24 }
 0x84e   :  { %1882 = vmatprep.subr.bf16.mxu1 %v2118_v9 }
 0x866   :  { %v632_v17 = vpop.permute.xlu1 %631 }
 0x867   :  { %1726 = vmatmul.mubr.msk.f32.gmra.mrb[14].mxu1 %vm56_vm0, %v632_v17 }
 0x868   :  { %977 = vmatprep.mubr.f32.mxu1 %v2047_v3 }
 0x91b   :  { %v703_v18 = vpop.f32.mrb[12].mxu1 }
 0x91c   :  { %v714_v19 = vadd.f32 %v703_v18, %v2227_v58  ;;  %v705_v20 = vpop.f32.mrb[13].mxu1 }
 0x91e   :  { %1967 = vtanh.f32 %v714_v19  ;;  %v1727_v9 = vmul.f32 -1.442695, %v714_v19 }
 0x928   :  { %v1968_v21 = vpop.eup %1967 }
 0x929   :  { %736 = vrot.lane.b32.xlu0 %v1968_v21, %s2048_s0 }
 0x93a   :  { %v708_v23 = vpop.f32.mrb[14].mxu1 }
 0x93b   :  { %v709_v25 = vpop.f32.mrb[15].mxu1 }
 0x93c   :  { %v717_v26 = vadd.f32 %v709_v25, %v2234_v1 }
 0x93e   :  { %1969 = vtanh.f32 %v717_v26  ;;  %v1728_v32 = vmul.f32 -1.442695, %v717_v26 }
 0x93f   :  { %1971 = vpow2.f32 %v1727_v9 }
 0x948   :  { %v1970_v27 = vpop.eup %1969 }
 0x949   :  { %738 = vrot.lane.b32.xlu1 %v1970_v27, %s2048_s0  ;;  %v1972_v28 = vpop.eup %1971 }
 0x94a   :  { %v724_v29 = vadd.f32 1.0, %v1972_v28 }
 0x94c   :  { %1973 = vrcp.f32 %v724_v29 }
 0x94d   :  { %1975 = vpow2.f32 %v1728_v32 }
 0x956   :  { %v1974_v30 = vpop.eup %1973 }
 0x957   :  { %v1976_v34 = vpop.eup %1975  ;;  %v732_v38 = vmul.f32 %v1974_v30, %v613_v62 }
 0x958   :  { %v725_v35 = vadd.f32 1.0, %v1976_v34 }
 0x95a   :  { %1977 = vrcp.f32 %v725_v35 }
 0x964   :  { %v1978_v1 = vpop.eup %1977 }
 0x965   :  { %v733_v42 = vmul.f32 %v1978_v1, %v614_v48 }
 0x99b   :  { %v737_v58 = vpop.permute.xlu0 %736 }
 0x99c   :  { %v742_v33 = vmul.f32 %v1974_v30, %v737_v58 }
 0x99e   :  { %746 = vrot.lane.b32.xlu0 %v742_v33, %s2048_s0 }
 0x9bb   :  { %v739_v36 = vpop.permute.xlu1 %738 }
 0x9bc   :  { %v743_v37 = vmul.f32 %v1978_v1, %v739_v36 }
 0x9be   :  { %748 = vrot.lane.b32.xlu1 %v743_v37, %s2048_s0 }
 0xa10   :  { %v747_v39 = vpop.permute.xlu0 %746 }
 0xa11   :  { %v752_v40 = vadd.f32 %v747_v39, %v732_v38 }
 0xa13   :  { %1979 = vtanh.f32 %v752_v40 }
 0xa1d   :  { %v1980_v41 = vpop.eup %1979 }
 0xa1e   :  { %758 = vrot.lane.b32.xlu0 %v1980_v41, %s2048_s0 }
 0xa30   :  { %v749_v43 = vpop.permute.xlu1 %748 }
 0xa31   :  { %v753_v46 = vadd.f32 %v749_v43, %v733_v42 }
 0xa33   :  { %1981 = vtanh.f32 %v753_v46 }
 0xa3d   :  { %v1982_v47 = vpop.eup %1981 }
 0xa3e   :  { %760 = vrot.lane.b32.xlu1 %v1982_v47, %s2048_s0 }
 0xa90   :  { %v759_v54 = vpop.permute.xlu0 %758 }
 0xa91   :  { %v764_v49 = vmul.f32 %v1974_v30, %v759_v54 }
 0xa93   :  { %768 = vrot.lane.b32.xlu0 %v764_v49, %s2049_s2 }
 0xab0   :  { %v761_v50 = vpop.permute.xlu1 %760 }
 0xab1   :  { %v2327_v52 = vmul.f32 %v1978_v1, %v761_v50 }
 0xab3   :  { %770 = vrot.lane.b32.xlu1 %v2327_v52, %s2049_s2 }
 0xb05   :  { %v769_v53 = vpop.permute.xlu0 %768 }
 0xb06   :  { %1328 = vst.msk [vmem:[%s2545_s7 + $0x18] sm:$0xff] %vm56_vm0, %v769_v53  ;;  %1729 = vmatmul.mubr.msk.f32.vlgmr.msra.gmra.mrb[16].mxu0 %vm56_vm0, %v769_v53 }
 0xb07   :  { %845 = vmatprep.mubr.f32.mxu0 %v2047_v3  ;;  %1876 = vmatpush1.bf16.msra.mxu0 %v2129_v13 }
 0xb08   :  { %1878 = vmatprep.subr.bf16.mxu0 %v2151_v22 }
 0xb0b   :  { %1880 = vmatpush1.bf16.msra.mxu0 %v2156_v24 }
 0xb25   :  { %v771_v6 = vpop.permute.xlu1 %770 }
 0xb26   :  { %1730 = vmatmul.mubr.msk.f32.gmra.mrb[18].mxu0 %vm56_vm0, %v771_v6 }
 0xb27   :  { %1114 = vmatprep.mubr.f32.mxu0 %v2047_v3 }
 0xbd9   :  { %v842_v55 = vpop.f32.mrb[16].mxu0 }
 0xbda   :  { %v852_v57 = vadd.f32 %v842_v55, %v2232_v63  ;;  %v844_v59 = vpop.f32.mrb[17].mxu0 }
 0xbdc   :  { %1983 = vtanh.f32 %v852_v57  ;;  %v1731_v48 = vmul.f32 -1.442695, %v852_v57 }
 0xbe6   :  { %v1984_v61 = vpop.eup %1983 }
 0xbe7   :  { %873 = vrot.lane.b32.xlu0 %v1984_v61, %s2048_s0 }
 0xbf9   :  { %v847_v62 = vpop.f32.mrb[18].mxu0 }
 0xbfa   :  { %v848_v0 = vpop.f32.mrb[19].mxu0 }
 0xbfb   :  { %v854_v2 = vadd.f32 %v848_v0, %v2229_v60 }
 0xbfd   :  { %1985 = vtanh.f32 %v854_v2  ;;  %v1732_v16 = vmul.f32 -1.442695, %v854_v2 }
 0xbfe   :  { %1987 = vpow2.f32 %v1731_v48 }
 0xc07   :  { %v1986_v5 = vpop.eup %1985 }
 0xc08   :  { %875 = vrot.lane.b32.xlu1 %v1986_v5, %s2048_s0  ;;  %v1988_v7 = vpop.eup %1987 }
 0xc09   :  { %v861_v10 = vadd.f32 1.0, %v1988_v7 }
 0xc0b   :  { %1989 = vrcp.f32 %v861_v10 }
 0xc0c   :  { %1991 = vpow2.f32 %v1732_v16 }
 0xc15   :  { %v1990_v12 = vpop.eup %1989 }
 0xc16   :  { %v1992_v17 = vpop.eup %1991  ;;  %v869_v21 = vmul.f32 %v1990_v12, %v752_v40 }
 0xc17   :  { %v862_v18 = vadd.f32 1.0, %v1992_v17 }
 0xc19   :  { %1993 = vrcp.f32 %v862_v18 }
 0xc23   :  { %v1994_v60 = vpop.eup %1993 }
 0xc24   :  { %v870_v27 = vmul.f32 %v1994_v60, %v753_v46 }
 0xc59   :  { %v874_v63 = vpop.permute.xlu0 %873 }
 0xc5a   :  { %v879_v15 = vmul.f32 %v1990_v12, %v874_v63 }
 0xc5c   :  { %883 = vrot.lane.b32.xlu0 %v879_v15, %s2048_s0 }
 0xc7a   :  { %v876_v19 = vpop.permute.xlu1 %875 }
 0xc7b   :  { %v880_v20 = vmul.f32 %v1994_v60, %v876_v19 }
 0xc7d   :  { %885 = vrot.lane.b32.xlu1 %v880_v20, %s2048_s0 }
 0xcce   :  { %v884_v23 = vpop.permute.xlu0 %883 }
 0xccf   :  { %v889_v25 = vadd.f32 %v884_v23, %v869_v21 }
 0xcd1   :  { %1995 = vtanh.f32 %v889_v25 }
 0xcdb   :  { %v1996_v26 = vpop.eup %1995 }
 0xcdc   :  { %895 = vrot.lane.b32.xlu0 %v1996_v26, %s2048_s0 }
 0xcef   :  { %v886_v9 = vpop.permute.xlu1 %885 }
 0xcf0   :  { %v890_v28 = vadd.f32 %v886_v9, %v870_v27 }
 0xcf2   :  { %1997 = vtanh.f32 %v890_v28 }
 0xcfc   :  { %v1998_v29 = vpop.eup %1997 }
 0xcfd   :  { %897 = vrot.lane.b32.xlu1 %v1998_v29, %s2048_s0 }
 0xd4e   :  { %v896_v30 = vpop.permute.xlu0 %895 }
 0xd4f   :  { %v901_v58 = vmul.f32 %v1990_v12, %v896_v30 }
 0xd51   :  { %905 = vrot.lane.b32.xlu0 %v901_v58, %s2049_s2 }
 0xd6f   :  { %v898_v32 = vpop.permute.xlu1 %897 }
 0xd70   :  { %v2351_v33 = vmul.f32 %v1994_v60, %v898_v32 }
 0xd72   :  { %907 = vrot.lane.b32.xlu1 %v2351_v33, %s2049_s2 }
 0xdc3   :  { %v906_v34 = vpop.permute.xlu0 %905 }
 0xdc4   :  { %1329 = vst.msk [vmem:[%s2545_s7 + $0x20] sm:$0xff] %vm56_vm0, %v906_v34  ;;  %1733 = vmatmul.mubr.msk.f32.vlgmr.msra.gmra.mrb[16].mxu1 %vm56_vm0, %v906_v34 }
 0xdc5   :  { %982 = vmatprep.mubr.f32.mxu1 %v2047_v3  ;;  %1884 = vmatpush1.bf16.msra.mxu1 %v2129_v13 }
 0xdc6   :  { %1886 = vmatprep.subr.bf16.mxu1 %v2151_v22 }
 0xdc9   :  { %1888 = vmatpush1.bf16.msra.mxu1 %v2156_v24 }
 0xde4   :  { %v908_v35 = vpop.permute.xlu1 %907 }
 0xde5   :  { %1734 = vmatmul.mubr.msk.f32.gmra.mrb[18].mxu1 %vm56_vm0, %v908_v35 }
 0xde6   :  { %1251 = vmatprep.mubr.f32.mxu1 %v2047_v3 }
 0xe97   :  { %v979_v1 = vpop.f32.mrb[16].mxu1 }
 0xe98   :  { %v989_v36 = vadd.f32 %v979_v1, %v2236_v4  ;;  %v981_v37 = vpop.f32.mrb[17].mxu1 }
 0xe9a   :  { %1999 = vtanh.f32 %v989_v36  ;;  %v1735_v24 = vmul.f32 -1.442695, %v989_v36 }
 0xea4   :  { %v2000_v38 = vpop.eup %1999 }
 0xea5   :  { %1010 = vrot.lane.b32.xlu0 %v2000_v38, %s2048_s0 }
 0xeb8   :  { %v984_v39 = vpop.f32.mrb[18].mxu1 }
 0xeb9   :  { %v985_v40 = vpop.f32.mrb[19].mxu1 }
 0xeba   :  { %v991_v13 = vadd.f32 %v985_v40, %v2225_v56 }
 0xebc   :  { %2001 = vtanh.f32 %v991_v13  ;;  %v1736_v47 = vmul.f32 -1.442695, %v991_v13 }
 0xebd   :  { %2003 = vpow2.f32 %v1735_v24 }
 0xec6   :  { %v2002_v22 = vpop.eup %2001 }
 0xec7   :  { %1012 = vrot.lane.b32.xlu1 %v2002_v22, %s2048_s0  ;;  %v2004_v41 = vpop.eup %2003 }
 0xec8   :  { %v998_v42 = vadd.f32 1.0, %v2004_v41 }
 0xeca   :  { %2005 = vrcp.f32 %v998_v42 }
 0xecb   :  { %2007 = vpow2.f32 %v1736_v47 }
 0xed4   :  { %v2006_v43 = vpop.eup %2005 }
 0xed5   :  { %v2008_v54 = vpop.eup %2007  ;;  %v1006_v6 = vmul.f32 %v2006_v43, %v889_v25 }
 0xed6   :  { %v999_v49 = vadd.f32 1.0, %v2008_v54 }
 0xed8   :  { %2009 = vrcp.f32 %v999_v49 }
 0xee2   :  { %v2010_v56 = vpop.eup %2009 }
 0xee3   :  { %v1007_v61 = vmul.f32 %v2010_v56, %v890_v28 }
 0xf17   :  { %v1011_v4 = vpop.permute.xlu0 %1010 }
 0xf18   :  { %v1016_v46 = vmul.f32 %v2006_v43, %v1011_v4 }
 0xf1a   :  { %1020 = vrot.lane.b32.xlu0 %v1016_v46, %s2048_s0 }
 0xf39   :  { %v1013_v50 = vpop.permute.xlu1 %1012 }
 0xf3a   :  { %v1017_v53 = vmul.f32 %v2010_v56, %v1013_v50 }
 0xf3c   :  { %1022 = vrot.lane.b32.xlu1 %v1017_v53, %s2048_s0 }
 0xf8c   :  { %v1021_v55 = vpop.permute.xlu0 %1020 }
 0xf8d   :  { %v1026_v57 = vadd.f32 %v1021_v55, %v1006_v6 }
 0xf8f   :  { %2011 = vtanh.f32 %v1026_v57 }
 0xf99   :  { %v2012_v59 = vpop.eup %2011 }
 0xf9a   :  { %1032 = vrot.lane.b32.xlu0 %v2012_v59, %s2048_s0 }
 0xfae   :  { %v1023_v62 = vpop.permute.xlu1 %1022 }
 0xfaf   :  { %v1027_v0 = vadd.f32 %v1023_v62, %v1007_v61 }
 0xfb1   :  { %2013 = vtanh.f32 %v1027_v0 }
 0xfbb   :  { %v2014_v2 = vpop.eup %2013 }
 0xfbc   :  { %1034 = vrot.lane.b32.xlu1 %v2014_v2, %s2048_s0 }
0x100c   :  { %v1033_v5 = vpop.permute.xlu0 %1032 }
0x100d   :  { %v1038_v48 = vmul.f32 %v2006_v43, %v1033_v5 }
0x100f   :  { %1042 = vrot.lane.b32.xlu0 %v1038_v48, %s2049_s2 }
0x102e   :  { %v1035_v7 = vpop.permute.xlu1 %1034 }
0x102f   :  { %v2375_v10 = vmul.f32 %v2010_v56, %v1035_v7 }
0x1031   :  { %1044 = vrot.lane.b32.xlu1 %v2375_v10, %s2049_s2 }
0x1081   :  { %v1043_v12 = vpop.permute.xlu0 %1042 }
0x1082   :  { %1330 = vst.msk [vmem:[%s2545_s7 + $0x28] sm:$0xff] %vm56_vm0, %v1043_v12  ;;  %1737 = vmatmul.mubr.msk.f32.vlgmr.msra.gmra.mrb[20].mxu0 %vm56_vm0, %v1043_v12 }
0x1083   :  { %1119 = vmatprep.mubr.f32.mxu0 %v2047_v3 }
0x10a3   :  { %v1045_v63 = vpop.permute.xlu1 %1044 }
0x10a4   :  { %1738 = vmatmul.mubr.msk.f32.gmra.mrb[22].mxu0 %vm56_vm0, %v1045_v63 }
0x10a5   :  { %1781 = vmatprep.mubr.msk.f32.mxu0 %vm2051_vm1, %v2047_v3 }
0x1155   :  { %v1116_v15 = vpop.f32.mrb[20].mxu0 }
0x1156   :  { %v1126_v16 = vadd.f32 %v1116_v15, %v2240_v8  ;;  %v1118_v17 = vpop.f32.mrb[21].mxu0 }
0x1158   :  { %2015 = vtanh.f32 %v1126_v16  ;;  %v1739_v23 = vmul.f32 -1.442695, %v1126_v16 }
0x1162   :  { %v2016_v18 = vpop.eup %2015 }
0x1163   :  { %1147 = vrot.lane.b32.xlu0 %v2016_v18, %s2048_s0 }
0x1177   :  { %v1121_v60 = vpop.f32.mrb[22].mxu0 }
0x1178   :  { %v1122_v19 = vpop.f32.mrb[23].mxu0 }
0x1179   :  { %v1128_v20 = vadd.f32 %v1122_v19, %v2221_v51  ;;  %v2050_v19 = vmov 0.0|0.0  }
0x117a   :  { %1895 = vmatprep.subr.bf16.mxu1 %v2050_v19  ;;  %1889 = vmatprep.subr.bf16.mxu0 %v2050_v19 }
0x117b   :  { %2017 = vtanh.f32 %v1128_v20  ;;  %v1740_v28 = vmul.f32 -1.442695, %v1128_v20  ;;  %v1367_v20 = vld [vmem:[%s2546_s4] sm:$0xff] }
0x117c   :  { %2019 = vpow2.f32 %v1739_v23  ;;  %v1369_v23 = vld [vmem:[%s2546_s4 + $0x10] sm:$0xff] }
0x1185   :  { %v2018_v21 = vpop.eup %2017 }
0x1186   :  { %1149 = vrot.lane.b32.xlu1 %v2018_v21, %s2048_s0  ;;  %v2020_v25 = vpop.eup %2019  ;;  %v1368_v21 = vld [vmem:[%s2546_s4 + $0x8] sm:$0xff] }
0x1187   :  { %v1135_v26 = vadd.f32 1.0, %v2020_v25  ;;  %v1896_v25 = vpack.c.bf16 %v1368_v21, %v1367_v20 }
0x1189   :  { %2021 = vrcp.f32 %v1135_v26  ;;  %v1370_v26 = vld [vmem:[%s2546_s4 + $0x18] sm:$0xff] }
0x118a   :  { %2023 = vpow2.f32 %v1740_v28  ;;  %v1375_v28 = vld [vmem:[%s2547_s5] sm:$0xff] }
0x1193   :  { %v2022_v27 = vpop.eup %2021 }
0x1194   :  { %v2024_v29 = vpop.eup %2023  ;;  %v1143_v34 = vmul.f32 %v2022_v27, %v1026_v57 }
0x1195   :  { %v1136_v30 = vadd.f32 1.0, %v2024_v29  ;;  %v1376_v29 = vld [vmem:[%s2547_s5 + $0x8] sm:$0xff] }
0x1197   :  { %2025 = vrcp.f32 %v1136_v30  ;;  %v1377_v30 = vld [vmem:[%s2547_s5 + $0x10] sm:$0xff] }
0x11a1   :  { %v2026_v51 = vpop.eup %2025 }
0x11a2   :  { %v1144_v37 = vmul.f32 %v2026_v51, %v1027_v0 }
0x11d5   :  { %v1148_v8 = vpop.permute.xlu0 %1147 }
0x11d6   :  { %v1153_v9 = vmul.f32 %v2022_v27, %v1148_v8 }
0x11d8   :  { %1157 = vrot.lane.b32.xlu0 %v1153_v9, %s2048_s0 }
0x11f8   :  { %v1150_v58 = vpop.permute.xlu1 %1149 }
0x11f9   :  { %v1154_v32 = vmul.f32 %v2026_v51, %v1150_v58  ;;  %v1378_v58 = vld [vmem:[%s2547_s5 + $0x18] sm:$0xff] }
0x11fb   :  { %1159 = vrot.lane.b32.xlu1 %v1154_v32, %s2048_s0  ;;  %v1893_v32 = vpack.c.bf16 %v1378_v58, %v1377_v30 }
0x124a   :  { %v1158_v35 = vpop.permute.xlu0 %1157 }
0x124b   :  { %v1163_v1 = vadd.f32 %v1158_v35, %v1143_v34 }
0x124d   :  { %2027 = vtanh.f32 %v1163_v1 }
0x1257   :  { %v2028_v36 = vpop.eup %2027 }
0x1258   :  { %1169 = vrot.lane.b32.xlu0 %v2028_v36, %s2048_s0 }
0x126d   :  { %v1160_v38 = vpop.permute.xlu1 %1159 }
0x126e   :  { %v1164_v39 = vadd.f32 %v1160_v38, %v1144_v37 }
0x1270   :  { %2029 = vtanh.f32 %v1164_v39 }
0x127a   :  { %v2030_v40 = vpop.eup %2029 }
0x127b   :  { %1171 = vrot.lane.b32.xlu1 %v2030_v40, %s2048_s0  ;;  %v1380_v40 = vld [vmem:[%s2547_s5 + $0x28] sm:$0xff] }
0x12ca   :  { %v1170_v13 = vpop.permute.xlu0 %1169 }
0x12cb   :  { %v1175_v22 = vmul.f32 %v2022_v27, %v1170_v13  ;;  %v1899_v27 = vpack.c.bf16 %v1370_v26, %v1369_v23 }
0x12cd   :  { %1179 = vrot.lane.b32.xlu0 %v1175_v22, %s2049_s2  ;;  %v1381_v22 = vld [vmem:[%s2547_s5 + $0x30] sm:$0xff] }
0x12ed   :  { %v1172_v24 = vpop.permute.xlu1 %1171 }
0x12ee   :  { %v2395_v41 = vmul.f32 %v2026_v51, %v1172_v24  ;;  %v1890_v51 = vpack.c.bf16 %v1376_v29, %v1375_v28  ;;  %v1382_v24 = vld [vmem:[%s2547_s5 + $0x38] sm:$0xff] }
0x12f0   :  { %1181 = vrot.lane.b32.xlu1 %v2395_v41, %s2049_s2  ;;  %1891 = vmatpush3.bf16.msra.mxu0 %v1890_v51 }
0x12f1   :  { %1892 = vmatprep.subr.bf16.mxu0 %v2050_v19 }
0x12f4   :  { %1894 = vmatpush3.bf16.msra.mxu0 %v1893_v32 }
0x12f5   :  { %1901 = vmatprep.subr.bf16.mxu0 %v2050_v19 }
0x133f   :  { %v1180_v42 = vpop.permute.xlu0 %1179 }
0x1340   :  { %1331 = vst.msk [vmem:[%s2545_s7 + $0x30] sm:$0xff] %vm56_vm0, %v1180_v42  ;;  %1741 = vmatmul.mubr.msk.f32.vlgmr.msra.gmra.mrb[20].mxu1 %vm56_vm0, %v1180_v42 }
0x1341   :  { %1256 = vmatprep.mubr.f32.mxu1 %v2047_v3  ;;  %1897 = vmatpush3.bf16.msra.mxu1 %v1896_v25 }
0x1342   :  { %1898 = vmatprep.subr.bf16.mxu1 %v2050_v19 }
0x1345   :  { %1900 = vmatpush3.bf16.msra.mxu1 %v1899_v27 }
0x1346   :  { %1907 = vmatprep.subr.bf16.mxu1 %v2050_v19 }
0x1362   :  { %v1182_v43 = vpop.permute.xlu1 %1181 }
0x1363   :  { %1742 = vmatmul.mubr.msk.f32.gmra.mrb[22].mxu1 %vm56_vm0, %v1182_v43  ;;  %v1905_v43 = vpack.c.bf16 %v1382_v24, %v1381_v22 }
0x1364   :  { %1792 = vmatprep.mubr.msk.f32.mxu1 %vm2051_vm1, %v2047_v3 }
0x1413   :  { %v1253_v4 = vpop.f32.mrb[20].mxu1 }
0x1414   :  { %v1263_v46 = vadd.f32 %v1253_v4, %v2244_v14  ;;  %v1255_v47 = vpop.f32.mrb[21].mxu1 }
0x1416   :  { %2031 = vtanh.f32 %v1263_v46  ;;  %v1743_v6 = vmul.f32 -1.442695, %v1263_v46 }
0x1420   :  { %v2032_v54 = vpop.eup %2031 }
0x1421   :  { %1284 = vrot.lane.b32.xlu0 %v2032_v54, %s2048_s0 }
0x1436   :  { %v1258_v49 = vpop.f32.mrb[22].mxu1 }
0x1437   :  { %v1259_v56 = vpop.f32.mrb[23].mxu1 }
0x1438   :  { %v1265_v50 = vadd.f32 %v1259_v56, %v2217_v44 }
0x143a   :  { %2033 = vtanh.f32 %v1265_v50  ;;  %v1744_v62 = vmul.f32 -1.442695, %v1265_v50 }
0x143b   :  { %2035 = vpow2.f32 %v1743_v6  ;;  %v1747_v6 = vld [vmem:[%s2548_s6] ss:$0 sm:$0xff] }
0x1444   :  { %v2034_v53 = vpop.eup %2033 }
0x1445   :  { %1286 = vrot.lane.b32.xlu1 %v2034_v53, %s2048_s0  ;;  %v2036_v55 = vpop.eup %2035 }
0x1446   :  { %v1272_v57 = vadd.f32 1.0, %v2036_v55 }
0x1448   :  { %2037 = vrcp.f32 %v1272_v57 }
0x1449   :  { %2039 = vpow2.f32 %v1744_v62 }
0x1452   :  { %v2038_v59 = vpop.eup %2037 }
0x1453   :  { %v2040_v0 = vpop.eup %2039  ;;  %v1280_v7 = vmul.f32 %v2038_v59, %v1163_v1 }
0x1454   :  { %v1273_v2 = vadd.f32 1.0, %v2040_v0  ;;  %v1751_v0 = vld [vmem:[%s2548_s6 + $0x1] ss:$0 sm:$0xff] }
0x1456   :  { %2041 = vrcp.f32 %v1273_v2 }
0x1460   :  { %v2042_v44 = vpop.eup %2041 }
0x1461   :  { %v1281_v16 = vmul.f32 %v2042_v44, %v1164_v39  ;;  %v1379_v39 = vld [vmem:[%s2547_s5 + $0x20] sm:$0xff] }
0x1462   :  { %v1902_v13 = vpack.c.bf16 %v1380_v40, %v1379_v39 }
0x1493   :  { %v1285_v14 = vpop.permute.xlu0 %1284 }
0x1494   :  { %v1290_v61 = vmul.f32 %v2038_v59, %v1285_v14 }
0x1496   :  { %1294 = vrot.lane.b32.xlu0 %v1290_v61, %s2048_s0 }
0x14b7   :  { %v1287_v5 = vpop.permute.xlu1 %1286 }
0x14b8   :  { %v1291_v48 = vmul.f32 %v2042_v44, %v1287_v5 }
0x14ba   :  { %1296 = vrot.lane.b32.xlu1 %v1291_v48, %s2048_s0 }
0x1508   :  { %v1295_v12 = vpop.permute.xlu0 %1294 }
0x1509   :  { %v1300_v63 = vadd.f32 %v1295_v12, %v1280_v7 }
0x150b   :  { %2043 = vtanh.f32 %v1300_v63 }
0x1515   :  { %v2044_v15 = vpop.eup %2043 }
0x1516   :  { %1306 = vrot.lane.b32.xlu0 %v2044_v15, %s2048_s0 }
0x152c   :  { %v1297_v17 = vpop.permute.xlu1 %1296 }
0x152d   :  { %v1301_v18 = vadd.f32 %v1297_v17, %v1281_v16 }
0x152f   :  { %2045 = vtanh.f32 %v1301_v18 }
0x1539   :  { %v2046_v60 = vpop.eup %2045 }
0x153a   :  { %1308 = vrot.lane.b32.xlu1 %v2046_v60, %s2048_s0 }
0x1588   :  { %v1307_v8 = vpop.permute.xlu0 %1306 }
0x1589   :  { %v1312_v9 = vmul.f32 %v2038_v59, %v1307_v8 }
0x158b   :  { %1315 = vrot.lane.b32.xlu0 %v1312_v9, %s2049_s2 }
0x158f   :  { %1539 = vrot.lane.b32.xlu0 %v1301_v18, %s2052_s13 }
0x1593   :  { %1338 = vrot.lane.b32.xlu0 %v2375_v10, %s2052_s13  ;;  %v1372_v10 = vld [vmem:[%s2546_s4 + $0x28] sm:$0xff] }
0x1597   :  { %1342 = vrot.lane.b32.xlu0 %v2327_v52, %s2052_s13  ;;  %v1371_v52 = vld [vmem:[%s2546_s4 + $0x20] sm:$0xff] }
0x1598   :  { %v1908_v1 = vpack.c.bf16 %v1372_v10, %v1371_v52 }
0x15ac   :  { %v1309_v34 = vpop.permute.xlu1 %1308 }
0x15ad   :  { %v1313_v35 = vmul.f32 %v2042_v44, %v1309_v34 }
0x15af   :  { %1334 = vrot.lane.b32.xlu0 %v1313_v35, %s2052_s13  ;;  %1383 = vrot.lane.b32.xlu1 %v1313_v35, %s2049_s2 }
0x15b3   :  { %1346 = vrot.lane.b32.xlu0 %v2277_v31, %s2052_s13  ;;  %1614 = vrot.lane.b32.xlu1 %v1300_v63, %s2052_s13  ;;  %v1373_v31 = vld [vmem:[%s2546_s4 + $0x30] sm:$0xff] }
0x15b7   :  { %1336 = vrot.lane.b32.xlu1 %v2395_v41, %s2052_s13 }
0x15bb   :  { %1340 = vrot.lane.b32.xlu1 %v2351_v33, %s2052_s13  ;;  %v1374_v33 = vld [vmem:[%s2546_s4 + $0x38] sm:$0xff] }
0x15bf   :  { %1344 = vrot.lane.b32.xlu1 %v2302_v11, %s2052_s13 }
0x15c3   :  { %1348 = vrot.lane.b32.xlu1 %v2252_v45, %s2052_s13  ;;  %v1911_v45 = vpack.c.bf16 %v1374_v33, %v1373_v31 }
0x15fd   :  { %v1316_v11 = vpop.permute.xlu0 %1315 }
0x15fe   :  { %1332 = vst.msk [vmem:[%s2545_s7 + $0x38] sm:$0xff] %vm56_vm0, %v1316_v11  ;;  %1793 = vmatmul.mubr.msk.f32.vlgmr.msra.gmra.mrb[24].mxu1 %vm56_vm0, %v1316_v11 }
0x15ff   :  { %1909 = vmatpush3.bf16.msra.mxu1 %v1908_v1  ;;  %1814 = vmatprep.mubr.msk.f32.mxu1 %vm2051_vm1, %v2047_v3 }
0x1600   :  { %1910 = vmatprep.subr.bf16.mxu1 %v2050_v19 }
0x1601   :  { %v1540_v36 = vpop.permute.xlu0 %1539 }
0x1603   :  { %1912 = vmatpush3.bf16.msra.mxu1 %v1911_v45 }
0x1605   :  { %v1339_v37 = vpop.permute.xlu0 %1338 }
0x1606   :  { %1361 = vst.msk [vmem:[%s2545_s7 + $0x10] sm:$0xff] %vm1358_vm2, %v1339_v37 }
0x1609   :  { %v1343_v38 = vpop.permute.xlu0 %1342 }
0x160a   :  { %1363 = vst.msk [vmem:[%s2545_s7 + $0x20] sm:$0xff] %vm1358_vm2, %v1343_v38 }
0x1621   :  { %v1335_v41 = vpop.permute.xlu0 %1334  ;;  %v1384_v42 = vpop.permute.xlu1 %1383 }
0x1622   :  { %1359 = vst.msk [vmem:[%s2545_s7] sm:$0xff] %vm1358_vm2, %v1335_v41  ;;  %1782 = vmatmul.mubr.msk.f32.vlgmr.msra.gmra.mrb[24].mxu0 %vm56_vm0, %v1384_v42 }
0x1623   :  { %1903 = vmatpush3.bf16.msra.mxu0 %v1902_v13  ;;  %1803 = vmatprep.mubr.msk.f32.mxu0 %vm2051_vm1, %v2047_v3 }
0x1624   :  { %1904 = vmatprep.subr.bf16.mxu0 %v2050_v19 }
0x1625   :  { %v1347_v4 = vpop.permute.xlu0 %1346  ;;  %v1615_v46 = vpop.permute.xlu1 %1614 }
0x1626   :  { %1365 = vst.msk [vmem:[%s2545_s7 + $0x30] sm:$0xff] %vm1358_vm2, %v1347_v4  ;;  %1815 = vmatmul.mubr.msk.f32.vlgmr.msra.gmra.mrb[26].mxu1 %vm56_vm0, %v1615_v46 }
0x1627   :  { %1906 = vmatpush3.bf16.msra.mxu0 %v1905_v43 }
0x1629   :  { %v1337_v47 = vpop.permute.xlu1 %1336 }
0x162a   :  { %1804 = vmatmul.mubr.msk.f32.vlgmr.msra.gmra.mrb[26].mxu0 %vm56_vm0, %v1540_v36  ;;  %1360 = vst.msk [vmem:[%s2545_s7 + $0x8] sm:$0xff] %vm1358_vm2, %v1337_v47 }
0x162d   :  { %v1341_v3 = vpop.permute.xlu1 %1340 }
0x162e   :  { %1362 = vst.msk [vmem:[%s2545_s7 + $0x18] sm:$0xff] %vm1358_vm2, %v1341_v3 }
0x1631   :  { %v1345_v54 = vpop.permute.xlu1 %1344 }
0x1632   :  { %1364 = vst.msk [vmem:[%s2545_s7 + $0x28] sm:$0xff] %vm1358_vm2, %v1345_v54 }
0x1635   :  { %v1349_v49 = vpop.permute.xlu1 %1348 }
0x1636   :  { %1366 = vst.msk [vmem:[%s2545_s7 + $0x38] sm:$0xff] %vm1358_vm2, %v1349_v49 }
0x16d1   :  { %v1525_v56 = vpop.f32.mrb[24].mxu1 }
0x16d2   :  { %v1794_v50 = vpop.f32.mrb[25].mxu1 }
0x16f5   :  { %v1453_v53 = vpop.f32.mrb[24].mxu0 }
0x16f6   :  { %v1526_v55 = vadd.f32 %v1525_v56, %v1453_v53  ;;  %v1783_v57 = vpop.f32.mrb[25].mxu0 }
0x16f8   :  { %v1536_v59 = vadd.f32 %v1747_v6, %v1526_v55 }
0x16f9   :  { %v1684_v14 = vpop.f32.mrb[26].mxu1 }
0x16fa   :  { %1537 = vst.msk [vmem:[%s2549_s8] sm:$0xff] %vm56_vm0, %v1536_v59  ;;  %v1816_v61 = vpop.f32.mrb[27].mxu1 }
0x16fd   :  { %v1609_v62 = vpop.f32.mrb[26].mxu0 }
0x16fe   :  { %v1685_v2 = vadd.f32 %v1684_v14, %v1609_v62  ;;  %v1805_v44 = vpop.f32.mrb[27].mxu0 }
0x1700   :  { %v1696_v5 = vadd.f32 %v1751_v0, %v1685_v2 }
0x1702   :  { %1752 = vst.msk [vmem:[%s2549_s8 + $0x8] sm:$0xff] %vm56_vm0, %v1696_v5 }

</bundles_post_ra>
